<compile_context>
chip_gen: v7x
topology: tpu7x:2x2x1
jax: 0.10.0
libtpu: 0.0.40
codegen_flags: <defaults>
</compile_context>

<pallas_src>
import functools

import jax
import jax.numpy as jnp
from jax.experimental import pallas as pl
from jax.experimental.pallas import tpu as pltpu


def radial_kernel(x_ref, cent_ref, bias_ref, o_ref, *, stable):
    # x_ref:    (2, TP)  pixel coordinates (channel 0, channel 1), lane-dense
    # cent_ref: (S, 2)   center coordinates, centers on sublanes
    # bias_ref: (S, 1)   per-center bias
    # o_ref:    (1, TP)  soft-min distance per pixel (lane-dense)
    x0 = x_ref[0:1, :].astype(jnp.float32)          # (1, TP)
    x1 = x_ref[1:2, :].astype(jnp.float32)          # (1, TP)
    cx = cent_ref[:, 0:1].astype(jnp.float32)       # (S, 1)
    cy = cent_ref[:, 1:2].astype(jnp.float32)       # (S, 1)

    d0 = x0 - cx                                    # (S, TP)
    d1 = x1 - cy                                    # (S, TP)
    dist = jnp.sqrt(d0 * d0 + d1 * d1) + bias_ref[...].astype(jnp.float32)

    z = dist * (-20.0)                              # (S, TP)
    if stable:
        m = jnp.max(z, axis=0, keepdims=True)       # (1, TP)
        lse = m + jnp.log(jnp.sum(jnp.exp(z - m), axis=0, keepdims=True))
    else:
        # coords/centers in [0,1], |bias| << 1 => z bounded; unshifted LSE is
        # safe in f32 and avoids one full (S,TP) pass + a sublane max reduce.
        lse = jnp.log(jnp.sum(jnp.exp(z), axis=0, keepdims=True))
    o_ref[...] = (lse * (-1.0 / 20.0)).astype(o_ref.dtype)


def _round_up(a, b):
    return (a + b - 1) // b * b


@functools.partial(jax.jit, static_argnames=("tile_p", "stable_softmin"))
def radial_forward(x, cent, bias, *, tile_p=1024, stable_softmin=False):
    """x: (B, 2, H, W) f32, cent: (1,2,1,1,S), bias: (1,1,1,1,S)."""
    B, C, H, W = x.shape
    assert C == 2
    S = cent.shape[-1]

    centT = cent.reshape(2, S).T.astype(jnp.float32)        # (S, 2)
    biasT = bias.reshape(S, 1).astype(jnp.float32)          # (S, 1)

    # (B,2,H,W) -> (2, P), pixels on the minor (lane) axis, P = B*H*W.
    P = B * H * W
    xp = jnp.transpose(x, (1, 0, 2, 3)).reshape(2, P).astype(jnp.float32)

    # Pixel tile: large enough to amortize ~0.35us/step, but never pad a small
    # problem past round_up(P,128), and keep >=2 grid steps when possible so
    # both v7x TensorCores get work.
    tile = min(tile_p, _round_up(P, 128))
    if _round_up(P, tile) // tile < 2 and P > 128:
        tile = _round_up(-(-P // 2), 128)
    P_pad = _round_up(P, tile)
    if P_pad != P:
        xp = jnp.pad(xp, ((0, 0), (0, P_pad - P)))

    out = pl.pallas_call(
        functools.partial(radial_kernel, stable=stable_softmin),
        out_shape=jax.ShapeDtypeStruct((1, P_pad), jnp.float32),
        grid_spec=pltpu.PrefetchScalarGridSpec(
            num_scalar_prefetch=0,
            grid=(P_pad // tile,),
            in_specs=[
                pl.BlockSpec((2, tile), lambda i: (0, i)),
                pl.BlockSpec((S, 2), lambda i: (0, 0)),
                pl.BlockSpec((S, 1), lambda i: (0, 0)),
            ],
            out_specs=pl.BlockSpec((1, tile), lambda i: (0, i)),
        ),
        compiler_params=pltpu.CompilerParams(
            dimension_semantics=("parallel",)),
    )(xp, centT, biasT)

    out = out[0, :P].reshape(1, B, H, W)            # matches torch's (1,B,H,W)
    if out.shape[1] == 1:                           # torch .squeeze(1) semantics
        out = jnp.squeeze(out, axis=1)
    return out


def init_radial_params(key, h, w, size):
    """Deterministic re-implementation of Radial.__init__ parameter shapes."""
    assert size == h * w
    gx, gy = jnp.meshgrid(jnp.linspace(0.0, 1.0, h),
                          jnp.linspace(0.0, 1.0, w), indexing="ij")
    grid = jnp.stack([gx, gy]).reshape(1, 2, 1, 1, size).astype(jnp.float32)
    k1, k2 = jax.random.split(key)
    cent = grid + jax.random.normal(k1, grid.shape, jnp.float32) * 0.001
    bias = (jnp.zeros((1, 1, 1, 1, size), jnp.float32)
            + jax.random.normal(k2, (1, 1, 1, 1, size), jnp.float32) * 0.001)
    return cent, bias


def radial_ref(x, cent, bias):
    """Plain-JAX reference mirroring the torch forward exactly."""
    vec = x[..., None] - cent                                    # (B,2,H,W,S)
    layers = jnp.sqrt(jnp.sum(vec * vec, axis=1)) + bias         # -> (1,B,H,W,S)
    mn = -jax.scipy.special.logsumexp(-layers * 20.0, axis=-1) / 20.0
    if mn.shape[1] == 1:
        mn = jnp.squeeze(mn, axis=1)
    return mn


if __name__ == "__main__":
    key = jax.random.PRNGKey(0)
    h = w = 16
    size = h * w           # 256 centers
    B, H, W = 2, 16, 16    # input coordinate grid

    k_param, k_x = jax.random.split(key)
    cent, bias = init_radial_params(k_param, h, w, size)
    x = jax.random.uniform(k_x, (B, 2, H, W), jnp.float32)

    ref = radial_ref(x, cent, bias)

    # fast path (default): unshifted logsumexp, lane-dense layout
    out = jax.block_until_ready(radial_forward(x, cent, bias))
    assert out.shape == ref.shape, (out.shape, ref.shape)
    assert jnp.allclose(out, ref, atol=1e-5, rtol=1e-5), float(
        jnp.max(jnp.abs(out - ref)))

    # stable path (for inputs outside [0,1]) — verified too
    out_s = jax.block_until_ready(
        radial_forward(x, cent, bias, stable_softmin=True))
    assert jnp.allclose(out_s, ref, atol=1e-5, rtol=1e-5), float(
        jnp.max(jnp.abs(out_s - ref)))

    print("KERNEL_OK")
</pallas_src>

<mosaic_0001>
module attributes {stable_mosaic.version = 11 : i64} {
  func.func @radial_kernel(%arg0: i32, %arg1: memref<2x256xf32, #tpu.memory_space<vmem>>, %arg2: memref<256x2xf32, #tpu.memory_space<vmem>>, %arg3: memref<256x1xf32, #tpu.memory_space<vmem>>, %arg4: memref<1x256xf32, #tpu.memory_space<vmem>>) attributes {dimension_semantics = [#tpu.dimension_semantics<parallel>], iteration_bounds = array<i64: 2>, scalar_prefetch = 0 : i64, scratch_operands = 0 : i64, tpu.core_type = #tpu.core_type<tc>, window_params = [{transform_indices = @transform_0, window_bounds = array<i64: 2, 256>}, {pipeline_mode = #tpu.pipeline_mode<synchronous>, transform_indices = @transform_1, window_bounds = array<i64: 256, 2>}, {pipeline_mode = #tpu.pipeline_mode<synchronous>, transform_indices = @transform_2, window_bounds = array<i64: 256, 1>}, {transform_indices = @transform_3, window_bounds = array<i64: 1, 256>}]} {
    %c0 = arith.constant 0 : index
    %c0_0 = arith.constant 0 : index
    %0 = vector.load %arg1[%c0, %c0_0] : memref<2x256xf32, #tpu.memory_space<vmem>>, vector<1x256xf32>
    %c1 = arith.constant 1 : index
    %c0_1 = arith.constant 0 : index
    %1 = vector.load %arg1[%c1, %c0_1] : memref<2x256xf32, #tpu.memory_space<vmem>>, vector<1x256xf32>
    %c0_2 = arith.constant 0 : index
    %c0_3 = arith.constant 0 : index
    %2 = vector.load %arg2[%c0_2, %c0_3] : memref<256x2xf32, #tpu.memory_space<vmem>>, vector<256x1xf32>
    %c0_4 = arith.constant 0 : index
    %c1_5 = arith.constant 1 : index
    %3 = vector.load %arg2[%c0_4, %c1_5] : memref<256x2xf32, #tpu.memory_space<vmem>>, vector<256x1xf32>
    %4 = vector.broadcast %0 : vector<1x256xf32> to vector<256x256xf32>
    %5 = vector.broadcast %2 : vector<256x1xf32> to vector<256x256xf32>
    %6 = arith.subf %4, %5 : vector<256x256xf32>
    %7 = vector.broadcast %1 : vector<1x256xf32> to vector<256x256xf32>
    %8 = vector.broadcast %3 : vector<256x1xf32> to vector<256x256xf32>
    %9 = arith.subf %7, %8 : vector<256x256xf32>
    %10 = arith.mulf %6, %6 : vector<256x256xf32>
    %11 = arith.mulf %9, %9 : vector<256x256xf32>
    %12 = arith.addf %10, %11 : vector<256x256xf32>
    %13 = math.sqrt %12 : vector<256x256xf32>
    %c0_6 = arith.constant 0 : index
    %c0_7 = arith.constant 0 : index
    %14 = vector.load %arg3[%c0_6, %c0_7] : memref<256x1xf32, #tpu.memory_space<vmem>>, vector<256x1xf32>
    %15 = vector.broadcast %14 : vector<256x1xf32> to vector<256x256xf32>
    %16 = arith.addf %13, %15 : vector<256x256xf32>
    %cst = arith.constant -2.000000e+01 : f32
    %17 = vector.broadcast %cst : f32 to vector<256x256xf32>
    %18 = arith.mulf %16, %17 : vector<256x256xf32>
    %19 = math.exp %18 : vector<256x256xf32>
    %cst_8 = arith.constant dense<0.000000e+00> : vector<256xf32>
    %20 = vector.multi_reduction <add>, %19, %cst_8 [0] : vector<256x256xf32> to vector<256xf32>
    %21 = vector.shape_cast %20 : vector<256xf32> to vector<1x256xf32>
    %22 = math.log %21 : vector<1x256xf32>
    %cst_9 = arith.constant -5.000000e-02 : f32
    %23 = vector.broadcast %cst_9 : f32 to vector<1x256xf32>
    %24 = arith.mulf %22, %23 : vector<1x256xf32>
    %c0_10 = arith.constant 0 : index
    %c0_11 = arith.constant 0 : index
    %25 = vector.load %arg4[%c0_10, %c0_11] : memref<1x256xf32, #tpu.memory_space<vmem>>, vector<1x256xf32>
    tpu.vector_store %arg4[%c0_10, %c0_11], %24 {strides = array<i32>} : memref<1x256xf32, #tpu.memory_space<vmem>>, vector<1x256xf32>,
    return
  }
  func.func @transform_0(%arg0: i32) -> (i32, i32) {
    %c0_i32 = arith.constant 0 : i32
    %c0_i32_0 = arith.constant 0 : i32
    return %c0_i32, %arg0 : i32, i32
  }
  func.func @transform_1(%arg0: i32) -> (i32, i32) {
    %c0_i32 = arith.constant 0 : i32
    %c0_i32_0 = arith.constant 0 : i32
    %c0_i32_1 = arith.constant 0 : i32
    return %c0_i32, %c0_i32_0 : i32, i32
  }
  func.func @transform_2(%arg0: i32) -> (i32, i32) {
    %c0_i32 = arith.constant 0 : i32
    %c0_i32_0 = arith.constant 0 : i32
    %c0_i32_1 = arith.constant 0 : i32
    return %c0_i32, %c0_i32_0 : i32, i32
  }
  func.func @transform_3(%arg0: i32) -> (i32, i32) {
    %c0_i32 = arith.constant 0 : i32
    %c0_i32_0 = arith.constant 0 : i32
    return %c0_i32, %arg0 : i32, i32
  }
}

</mosaic_0001>

<bundles_post_ra>
// kernel: squeeze.1
= control target key start
LH: loop header
LB: loop body
LE: loop exit
PB: predicated region body
PF: predicated region fallthrough
CT: control target
= control target key end

     0   :  { %s135_s0 = inlined_call_operand.vmem [shape: f32[512], index: 0, kind: input, shape index: {}]   ;;  %s136_s1 = inlined_call_operand.hbm [shape: f32[1,2,16,16], index: 1, kind: output, shape index: {}]  }
   0x1   :  { %v5_v0 = vld [vmem:[%s135_s0] sm:$0xf] }
   0x2   :  { %6 = vst [vmem:[#allocation2] sm:$0xf] %v5_v0 }
   0x3   :  { %2 = vsyncpa [#allocation1], 0  ;;  %s94_s0 = smov 112   ;;  %s95_s8 = smov 80   ;;  %vm8_vm0 = vcmask 130048  }
   0x4   :  { %s96_s9 = smov 96   ;;  %s97_s10 = smov 64  }
   0x5   :  { %s98_s11 = smov 48   ;;  %s99_s12 = smov 32  }
   0x6   :  { %s100_s13 = smov 16   ;;  %s101_s14 = smov [#allocation0]  }
   0x7   :  { %s56_s15 = sshll.u32 %s101_s14, 4  ;;  %s57_s15 = int_to_ptr.vmem [resolvable:$true] %s56_s15 }
   0x8   :  { %s70_s16 = scalar_lea.vmem %s57_s15, 512  ;;  %p75_p1 = scmp.lt.s32.totalorder %s57_s15, %s57_s15 }
   0x9   :  { %v10_v1 = vld [vmem:[#allocation2] sm:$0xf]   ;;  %p71_p0 = scmp.ne.s32.totalorder %s57_s15, %s70_s16  ;;  %p76_p2 = scmp.lt.s32.totalorder %s70_s16, %s70_s16 }
   0xa   :  { %v22_v2 = vld [vmem:[#allocation2] sm:$0xf]   ;;  %11 = vrot.lane.b32.xlu0 %v10_v1, %s94_s0 }
   0xb   :  { %23 = vrot.lane.b32.xlu1 %v22_v2, %s95_s8  ;;  %v16_v3 = vld [vmem:[#allocation2] sm:$0xf]   ;;  %p77_p3 = por %p76_p2, %p75_p1 }
   0xc   :  { %v28_v4 = vld [vmem:[#allocation2] sm:$0xf]  }
   0xd   :  { %v7_v5 = vld [vmem:[#allocation2] sm:$0xf]   ;;  %p78_p4 = pnand %p77_p3, %p71_p0 }
   0xe   :  { %9 = vst.msk [vmem:[#allocation0] ss:$8 sm:$0xf] %vm8_vm0, %v7_v5   ;;  %17 = vrot.lane.b32.xlu0 %v16_v3, %s96_s9  ;;  %v34_v6 = vld [vmem:[#allocation2] sm:$0xf]  }
   0xf   :  { %29 = vrot.lane.b32.xlu1 %v28_v4, %s97_s10  ;;  %v40_v7 = vld [vmem:[#allocation2] sm:$0xf]  }
  0x10   :  { %v46_v8 = vld [vmem:[#allocation2] sm:$0xf]  }
  0x12   :  { %35 = vrot.lane.b32.xlu0 %v34_v6, %s98_s11 }
  0x13   :  { %41 = vrot.lane.b32.xlu1 %v40_v7, %s99_s12 }
  0x16   :  { %47 = vrot.lane.b32.xlu0 %v46_v8, %s100_s13 }
  0x7c   :  { %v12_v9 = vpop.permute.xlu0 %11  }
  0x7d   :  { %v24_v10 = vpop.permute.xlu1 %23   ;;  %15 = vst.msk [vmem:[#allocation0 + $0x1] ss:$8 sm:$0xf] %vm8_vm0, %v12_v9  }
  0x7e   :  { %27 = vst.msk [vmem:[#allocation0 + $0x3] ss:$8 sm:$0xf] %vm8_vm0, %v24_v10  }
  0x80   :  { %v18_v11 = vpop.permute.xlu0 %17  }
  0x81   :  { %v30_v12 = vpop.permute.xlu1 %29   ;;  %21 = vst.msk [vmem:[#allocation0 + $0x2] ss:$8 sm:$0xf] %vm8_vm0, %v18_v11  }
  0x82   :  { %33 = vst.msk [vmem:[#allocation0 + $0x4] ss:$8 sm:$0xf] %vm8_vm0, %v30_v12  }
  0x84   :  { %v36_v13 = vpop.permute.xlu0 %35  }
  0x85   :  { %v42_v14 = vpop.permute.xlu1 %41   ;;  %39 = vst.msk [vmem:[#allocation0 + $0x5] ss:$8 sm:$0xf] %vm8_vm0, %v36_v13  }
  0x86   :  { %45 = vst.msk [vmem:[#allocation0 + $0x6] ss:$8 sm:$0xf] %vm8_vm0, %v42_v14  }
  0x88   :  { %v48_v15 = vpop.permute.xlu0 %47  }
  0x89   :  { %51 = vst.msk [vmem:[#allocation0 + $0x7] ss:$8 sm:$0xf] %vm8_vm0, %v48_v15  }
  0x8a   :  { %81 = shalt.err (!%p78_p4)
}
  0x8b   :  { %s82_s19 = scalar_lea.hbm %s136_s1, 512 }
  0x8c   :  { %p83_p5 = scmp.ne.s32.totalorder %s136_s1, %s82_s19  ;;  %p86_p6 = scmp.lt.u32.totalorder %s82_s19, %s136_s1 }
  0x8e   :  { %p88_p7 = pnand %p86_p6, %p83_p5 }
  0x90   :  { %91 = shalt.err (!%p88_p7)
}
  0x91   :  { %59 = dma.vmem_to_hbm [thread:$0]  %s57_s15, 512, %s136_s1, [#allocation1]  }
  0x92   :  { %92 = dma.done.wait [#allocation1], 512  }
  0x93   :  { %93 = vsyncadd [#allocation1], 4294966784 }
  0x94   :  { %61 = vsyncpa [#allocation1], 1 }

// kernel: radial_forward.1
= control target key start
LH: loop header
LB: loop body
LE: loop exit
PB: predicated region body
PF: predicated region fallthrough
CT: control target
= control target key end

     0   :  { %s2214_s12 = smov 0   ;;  %s3742_s0 = inlined_call_operand.vmem [shape: f32[2,512], index: 0, kind: input, shape index: {}]   ;;  %s3743_s1 = inlined_call_operand.vmem [shape: f32[256,2], index: 1, kind: input, shape index: {}]   ;;  %s3744_s2 = inlined_call_operand.vmem [shape: f32[256,1], index: 2, kind: input, shape index: {}]   ;;  %s3745_s3 = inlined_call_operand.vmem [shape: f32[1,512], index: 3, kind: output, shape index: {}]  }
   0x1 LB: > { %s1886_s13 = sadd.s32 4294967295, %s2189_s12   ;;  %p1890_p0 = scmp.ge.s32.totalorder %s2189_s12, 1  ;;  %s2189_s12 = sphi %s2214_s12, %s13_s12  }
   0x2   : > { %p138_p1 = scmp.lt.s32.totalorder %s2189_s12, 3 }
   0x4   : > { %p139_p2 = pnand %p1890_p0, %p138_p1 }
   0x6   : > { %142 = sbr.rel (%p139_p2) target bundleno = 479 (0x1df), region = 32 }
   0xd   : > { %v2225_v0 = vld [vmem:[%s3743_s1 + $0x10] sm:$0xff]  ;;  %v175_v1 = vld [vmem:[%s3743_s1] sm:$0xff]  ;;  %v2191_v2 = vmov 1   ;;  %v3747_v3 = vmov 0   ;;  %v178_v4 = vld [vmem:[%s3743_s1 + $0x18] sm:$0xff]  ;;  %s1891_s17 = sshll.u32 %s1886_s13, 1  ;;  %v3746_v45 = vlaneseq }
   0xe   : > { %1909 = vset.pattern.permute.xlu0 %v2191_v2  ;;  %1908 = vset.pattern.permute.xlu1 %v3747_v3  ;;  %v180_v5 = vld [vmem:[%s3743_s1 + $0x28] sm:$0xff]  ;;  %v182_v6 = vld [vmem:[%s3743_s1 + $0x38] sm:$0xff]  ;;  %v195_v14 = vld [vmem:[%s3743_s1 + $0xa0] sm:$0xff]  ;;  %p162_p3 = scmp.lt.s32.totalorder %s1891_s17, 3 }
   0xf   : > { %230 = vperm.xlu1 %1908, %v2225_v0   ;;  %454 = vperm.xlu0 %1909, %v175_v1   ;;  %v184_v7 = vld [vmem:[%s3743_s1 + $0x48] sm:$0xff]  ;;  %v186_v8 = vld [vmem:[%s3743_s1 + $0x58] sm:$0xff]  ;;  %v179_v19 = vld [vmem:[%s3743_s1 + $0x20] sm:$0xff]  ;;  %v2402_v47 = vshrl.u32 %v3746_v45, 7 }
  0x10   : > { %v188_v9 = vld [vmem:[%s3743_s1 + $0x68] sm:$0xff]  ;;  %v190_v10 = vld [vmem:[%s3743_s1 + $0x78] sm:$0xff]  ;;  %v181_v21 = vld [vmem:[%s3743_s1 + $0x30] sm:$0xff]  ;;  %s3825_s17 = smov (!%p162_p3, %s1891_s17), 3 }
  0x11   : > { %v192_v11 = vld [vmem:[%s3743_s1 + $0x88] sm:$0xff]  ;;  %v194_v12 = vld [vmem:[%s3743_s1 + $0x98] sm:$0xff]  ;;  %v183_v23 = vld [vmem:[%s3743_s1 + $0x40] sm:$0xff]  ;;  %s1892_s25 = sshll.u32 %s3825_s17, 1  ;;  %3760 = vst [vmem:[#allocation2_spill] sm:$0xff] %v2402_v47  ;;  %v210_v53 = vsub.s32 0, %v2402_v47  ;;  %s170_s13 = scalar_lea.vmem %s3745_s3, %s3825_s17 }
  0x12   : > { %v2263_v13 = vld [vmem:[%s3743_s1 + $0xa8] sm:$0xff]  ;;  %v2272_v15 = vld [vmem:[%s3743_s1 + $0xb8] sm:$0xff]  ;;  %v185_v24 = vld [vmem:[%s3743_s1 + $0x50] sm:$0xff]  ;;  %s165_s5 = scalar_lea.vmem %s3742_s0, %s1892_s25  ;;  %v214_v58 = vsub.s32 1, %v2402_v47 }
  0x13   : > { %235 = vperm.xlu1 %1908, %v178_v4   ;;  %466 = vperm.xlu0 %1909, %v178_v4   ;;  %v2279_v16 = vld [vmem:[%s3743_s1 + $0xc8] sm:$0xff]  ;;  %v2288_v18 = vld [vmem:[%s3743_s1 + $0xd8] sm:$0xff]  ;;  %v187_v25 = vld [vmem:[%s3743_s1 + $0x60] sm:$0xff] }
  0x14   : > { %v176_v17 = vld [vmem:[%s3743_s1 + $0x8] sm:$0xff]  ;;  %v2306_v22 = vld [vmem:[%s3743_s1 + $0xf8] sm:$0xff]  ;;  %v189_v26 = vld [vmem:[%s3743_s1 + $0x70] sm:$0xff] }
  0x15   : > { %v2297_v20 = vld [vmem:[%s3743_s1 + $0xe8] sm:$0xff]  ;;  %v191_v27 = vld [vmem:[%s3743_s1 + $0x80] sm:$0xff]  ;;  %v193_v28 = vld [vmem:[%s3743_s1 + $0x90] sm:$0xff] }
  0x16   : > { %v2332_v29 = vld [vmem:[%s3743_s1 + $0xb0] sm:$0xff]  ;;  %v2338_v30 = vld [vmem:[%s3743_s1 + $0xc0] sm:$0xff]  ;;  %v1286_v35 = vld [vmem:[%s3744_s2 + $0x8] sm:$0xff] }
  0x17   : > { %245 = vperm.xlu1 %1908, %v180_v5   ;;  %474 = vperm.xlu0 %1909, %v180_v5   ;;  %v2344_v31 = vld [vmem:[%s3743_s1 + $0xd0] sm:$0xff]  ;;  %v2350_v32 = vld [vmem:[%s3743_s1 + $0xe0] sm:$0xff]  ;;  %v1288_v38 = vld [vmem:[%s3744_s2 + $0x18] sm:$0xff] }
  0x18   : > { %v2356_v33 = vld [vmem:[%s3743_s1 + $0xf0] sm:$0xff]  ;;  %v1285_v34 = vld [vmem:[%s3744_s2] sm:$0xff]  ;;  %v1290_v40 = vld [vmem:[%s3744_s2 + $0x28] sm:$0xff] }
  0x19   : > { %v1287_v36 = vld [vmem:[%s3744_s2 + $0x10] sm:$0xff]  ;;  %v1289_v37 = vld [vmem:[%s3744_s2 + $0x20] sm:$0xff]  ;;  %v1292_v42 = vld [vmem:[%s3744_s2 + $0x38] sm:$0xff] }
  0x1a   : > { %v1291_v39 = vld [vmem:[%s3744_s2 + $0x30] sm:$0xff]  ;;  %v1293_v41 = vld [vmem:[%s3744_s2 + $0x40] sm:$0xff]  ;;  %v1296_v43 = vld [vmem:[%s3744_s2 + $0x58] sm:$0xff] }
  0x1b   : > { %255 = vperm.xlu1 %1908, %v182_v6   ;;  %482 = vperm.xlu0 %1909, %v182_v6   ;;  %v1294_v44 = vld [vmem:[%s3744_s2 + $0x48] sm:$0xff]  ;;  %v1299_v46 = vld [vmem:[%s3744_s2 + $0x70] sm:$0xff]  ;;  %v1894_v51 = vld [vmem:[%s165_s5 + $0x1] ss:$2 sm:$0x3] }
  0x1c   : > { %v1295_v50 = vld [vmem:[%s3744_s2 + $0x50] sm:$0xff]  ;;  %v1302_v52 = vld [vmem:[%s3744_s2 + $0x88] sm:$0xff]  ;;  %v172_v56 = vld [vmem:[%s165_s5] ss:$2 sm:$0x3]  ;;  %v2418_v57 = vrot.slane %v1894_v51, %v210_v53  ;;  %v2425_v62 = vrot.slane %v1894_v51, %v214_v58 }
  0x1d   : > { %v2422_v59 = vrot.slane %v172_v56, %v210_v53 }
  0x1f   : > { %265 = vperm.xlu1 %1908, %v184_v7   ;;  %490 = vperm.xlu0 %1909, %v184_v7  }
  0x23   : > { %275 = vperm.xlu1 %1908, %v186_v8   ;;  %498 = vperm.xlu0 %1909, %v186_v8  }
  0x27   : > { %285 = vperm.xlu1 %1908, %v188_v9   ;;  %506 = vperm.xlu0 %1909, %v188_v9  }
  0x2b   : > { %295 = vperm.xlu1 %1908, %v190_v10   ;;  %514 = vperm.xlu0 %1909, %v190_v10   ;;  %v1297_v10 = vld [vmem:[%s3744_s2 + $0x60] sm:$0xff] }
  0x2f   : > { %305 = vperm.xlu1 %1908, %v192_v11   ;;  %522 = vperm.xlu0 %1909, %v192_v11  }
  0x33   : > { %315 = vperm.xlu1 %1908, %v194_v12   ;;  %530 = vperm.xlu0 %1909, %v194_v12  }
  0x37   : > { %325 = vperm.xlu1 %1908, %v2263_v13   ;;  %534 = vperm.xlu0 %1909, %v195_v14  }
  0x3b   : > { %335 = vperm.xlu1 %1908, %v2272_v15   ;;  %1912 = vset.pattern.permute.xlu0 %v3747_v3 }
  0x3c   : > { %220 = vperm.xlu0 %1912, %v175_v1   ;;  %v2430_v1 = vrot.slane %v172_v56, %v214_v58 }
  0x3f   : > { %345 = vperm.xlu1 %1908, %v2279_v16  }
  0x40   : > { %225 = vperm.xlu0 %1912, %v176_v17  }
  0x43   : > { %355 = vperm.xlu1 %1908, %v2288_v18  }
  0x44   : > { %240 = vperm.xlu0 %1912, %v179_v19  }
  0x47   : > { %365 = vperm.xlu1 %1908, %v2297_v20  }
  0x48   : > { %250 = vperm.xlu0 %1912, %v181_v21  }
  0x4b   : > { %375 = vperm.xlu1 %1908, %v2306_v22  }
  0x4c   : > { %260 = vperm.xlu0 %1912, %v183_v23  }
  0x4f   : > { %1910 = vset.pattern.permute.xlu1 %v2191_v2 }
  0x50   : > { %458 = vperm.xlu1 %1910, %v176_v17   ;;  %270 = vperm.xlu0 %1912, %v185_v24  }
  0x54   : > { %462 = vperm.xlu1 %1910, %v2225_v0   ;;  %280 = vperm.xlu0 %1912, %v187_v25  }
  0x58   : > { %470 = vperm.xlu1 %1910, %v179_v19   ;;  %290 = vperm.xlu0 %1912, %v189_v26  }
  0x5c   : > { %478 = vperm.xlu1 %1910, %v181_v21   ;;  %300 = vperm.xlu0 %1912, %v191_v27  }
  0x60   : > { %486 = vperm.xlu1 %1910, %v183_v23   ;;  %310 = vperm.xlu0 %1912, %v193_v28  }
  0x64   : > { %494 = vperm.xlu1 %1910, %v185_v24   ;;  %320 = vperm.xlu0 %1912, %v195_v14  }
  0x68   : > { %502 = vperm.xlu1 %1910, %v187_v25   ;;  %330 = vperm.xlu0 %1912, %v2332_v29  }
  0x6c   : > { %510 = vperm.xlu1 %1910, %v189_v26   ;;  %340 = vperm.xlu0 %1912, %v2338_v30  }
  0x70   : > { %518 = vperm.xlu1 %1910, %v191_v27   ;;  %350 = vperm.xlu0 %1912, %v2344_v31  }
  0x74   : > { %526 = vperm.xlu1 %1910, %v193_v28   ;;  %360 = vperm.xlu0 %1912, %v2350_v32   ;;  %v1298_v28 = vld [vmem:[%s3744_s2 + $0x68] sm:$0xff] }
  0x78   : > { %1911 = vset.pattern.permute.xlu1 %v3747_v3  ;;  %370 = vperm.xlu0 %1912, %v2356_v33  }
  0x79   : > { %1319 = vperm.xlu1 %1911, %v1285_v34  }
  0x7c   : > { %1324 = vperm.xlu0 %1912, %v1286_v35  }
  0x7d   : > { %1329 = vperm.xlu1 %1911, %v1287_v36  }
  0x80   : > { %1339 = vperm.xlu0 %1912, %v1289_v37  }
  0x81   : > { %1334 = vperm.xlu1 %1911, %v1288_v38  }
  0x84   : > { %1349 = vperm.xlu0 %1912, %v1291_v39  }
  0x85   : > { %1344 = vperm.xlu1 %1911, %v1290_v40  }
  0x88   : > { %1359 = vperm.xlu0 %1912, %v1293_v41  }
  0x89   : > { %1354 = vperm.xlu1 %1911, %v1292_v42  }
  0x8c   : > { %1374 = vperm.xlu0 %1912, %v1296_v43  }
  0x8d   : > { %1364 = vperm.xlu1 %1911, %v1294_v44  }
  0x8e   : > { %v2404_v48 = vpop.permute.xlu1 %230  ;;  %v2406_v49 = vpop.permute.xlu0 %454 }
  0x90   : > { %1389 = vperm.xlu0 %1912, %v1299_v46  }
  0x91   : > { %1369 = vperm.xlu1 %1911, %v1295_v50   ;;  %v1305_v50 = vld [vmem:[%s3744_s2 + $0xa0] sm:$0xff] }
  0x92   : > { %v236_v54 = vpop.permute.xlu1 %235  ;;  %v467_v55 = vpop.permute.xlu0 %466 }
  0x93   : > { %v384_v63 = vsub.f32 %v2422_v59, %v236_v54  ;;  %v587_v0 = vsub.f32 %v2418_v57, %v467_v55  ;;  %v385_v6 = vsub.f32 %v2430_v1, %v236_v54  ;;  %v588_v8 = vsub.f32 %v2425_v62, %v467_v55 }
  0x94   : > { %1404 = vperm.xlu0 %1912, %v1302_v52  }
  0x95   : > { %1913 = vset.pattern.permute.xlu1 %v2191_v2  ;;  %v651_v7 = vmul.f32 %v384_v63, %v384_v63  ;;  %v715_v9 = vmul.f32 %v587_v0, %v587_v0  ;;  %v652_v19 = vmul.f32 %v385_v6, %v385_v6  ;;  %v716_v24 = vmul.f32 %v588_v8, %v588_v8 }
  0x96   : > { %v246_v60 = vpop.permute.xlu1 %245  ;;  %538 = vperm.xlu1 %1913, %v2263_v13   ;;  %v475_v61 = vpop.permute.xlu0 %474 }
  0x97   : > { %v388_v11 = vsub.f32 %v2422_v59, %v246_v60  ;;  %v389_v12 = vsub.f32 %v2430_v1, %v246_v60  ;;  %v591_v13 = vsub.f32 %v2418_v57, %v475_v61  ;;  %v592_v14 = vsub.f32 %v2425_v62, %v475_v61 }
  0x98   : > { %1918 = vset.pattern.permute.xlu0 %v2191_v2  ;;  %v2447_v25 = vadd.f32 %v715_v9, %v651_v7  ;;  %v2469_v60 = vadd.f32 %v716_v24, %v652_v19 }
  0x99   : > { %546 = vperm.xlu0 %1918, %v2272_v15   ;;  %v719_v36 = vmul.f32 %v591_v13, %v591_v13  ;;  %v720_v37 = vmul.f32 %v592_v14, %v592_v14 }
  0x9a   : > { %v256_v4 = vpop.permute.xlu1 %255  ;;  %542 = vperm.xlu1 %1913, %v2332_v29   ;;  %v483_v5 = vpop.permute.xlu0 %482  ;;  %v655_v29 = vmul.f32 %v388_v11, %v388_v11  ;;  %1923 = vrsqrt.f32 %v2447_v25  ;;  %vm881_vm0 = vcmp.eq.f32.partialorder %v2447_v25, inf  ;;  %vm883_vm1 = vcmp.eq.f32.partialorder %v2447_v25, 0.0 }
  0x9b   : > { %v595_v51 = vsub.f32 %v2418_v57, %v483_v5  ;;  %v393_v61 = vsub.f32 %v2430_v1, %v256_v4  ;;  %v596_v63 = vsub.f32 %v2425_v62, %v483_v5  ;;  %1925 = vrsqrt.f32 %v2469_v60 }
  0x9c   : > { %v2487_v14 = vadd.f32 %v719_v36, %v655_v29  ;;  %v1309_v29 = vld [vmem:[%s3744_s2 + $0xc0] sm:$0xff]  ;;  %vm888_vm2 = vcmp.eq.f32.partialorder %v2469_v60, inf  ;;  %vm890_vm3 = vcmp.eq.f32.partialorder %v2469_v60, 0.0 }
  0x9d   : > { %558 = vperm.xlu0 %1918, %v2344_v31   ;;  %v656_v31 = vmul.f32 %v389_v12, %v389_v12  ;;  %v723_v11 = vmul.f32 %v595_v51, %v595_v51 }
  0x9e   : > { %v266_v15 = vpop.permute.xlu1 %265  ;;  %1914 = vset.pattern.permute.xlu1 %v3747_v3  ;;  %v491_v17 = vpop.permute.xlu0 %490  ;;  %1927 = vrsqrt.f32 %v2487_v14  ;;  %vm909_vm4 = vcmp.eq.f32.partialorder %v2487_v14, inf  ;;  %vm911_vm5 = vcmp.eq.f32.partialorder %v2487_v14, 0.0 }
  0x9f   : > { %v396_v21 = vsub.f32 %v2422_v59, %v266_v15  ;;  %v397_v23 = vsub.f32 %v2430_v1, %v266_v15  ;;  %1379 = vperm.xlu1 %1914, %v1297_v10   ;;  %v599_v26 = vsub.f32 %v2418_v57, %v491_v17  ;;  %v600_v27 = vsub.f32 %v2425_v62, %v491_v17 }
  0xa0   : > { %v2489_v15 = vadd.f32 %v720_v37, %v656_v31 }
  0xa1   : > { %v663_v34 = vmul.f32 %v396_v21, %v396_v21  ;;  %v664_v35 = vmul.f32 %v397_v23, %v397_v23  ;;  %570 = vperm.xlu0 %1918, %v2297_v20   ;;  %v727_v38 = vmul.f32 %v599_v26, %v599_v26  ;;  %v728_v39 = vmul.f32 %v600_v27, %v600_v27 }
  0xa2   : > { %v276_v40 = vpop.permute.xlu1 %275  ;;  %v499_v41 = vpop.permute.xlu0 %498  ;;  %v392_v20 = vsub.f32 %v2422_v59, %v256_v4  ;;  %v1307_v4 = vld [vmem:[%s3744_s2 + $0xb0] sm:$0xff]  ;;  %v660_v21 = vmul.f32 %v393_v61, %v393_v61  ;;  %v724_v23 = vmul.f32 %v596_v63, %v596_v63  ;;  %1929 = vrsqrt.f32 %v2489_v15 }
  0xa3   : > { %v400_v42 = vsub.f32 %v2422_v59, %v276_v40  ;;  %v401_v43 = vsub.f32 %v2430_v1, %v276_v40  ;;  %v603_v44 = vsub.f32 %v2418_v57, %v499_v41  ;;  %v604_v46 = vsub.f32 %v2425_v62, %v499_v41  ;;  %1384 = vperm.xlu1 %1914, %v1298_v28  }
  0xa4   : > { %v2464_v52 = vadd.f32 %v727_v38, %v663_v34  ;;  %v2466_v53 = vadd.f32 %v728_v39, %v664_v35  ;;  %v659_v5 = vmul.f32 %v392_v20, %v392_v20  ;;  %vm916_vm6 = vcmp.eq.f32.partialorder %v2489_v15, inf }
  0xa5   : > { %v667_v54 = vmul.f32 %v400_v42, %v400_v42  ;;  %v668_v55 = vmul.f32 %v401_v43, %v401_v43  ;;  %v731_v56 = vmul.f32 %v603_v44, %v603_v44  ;;  %v732_v58 = vmul.f32 %v604_v46, %v604_v46  ;;  %1921 = vset.pattern.permute.xlu0 %v3747_v3 }
  0xa6   : > { %v286_v0 = vpop.permute.xlu1 %285  ;;  %1419 = vperm.xlu0 %1921, %v1305_v50   ;;  %v507_v6 = vpop.permute.xlu0 %506  ;;  %v2498_v31 = vadd.f32 %v723_v11, %v659_v5  ;;  %v2506_v43 = vadd.f32 %v724_v23, %v660_v21  ;;  %v1300_v50 = vld [vmem:[%s3744_s2 + $0x78] sm:$0xff]  ;;  %v1301_v5 = vld [vmem:[%s3744_s2 + $0x80] sm:$0xff]  ;;  %v382_v21 = vsub.f32 %v2422_v59, %v2404_v48  ;;  %v383_v23 = vsub.f32 %v2430_v1, %v2404_v48 }
  0xa7   : > { %v2474_v7 = vadd.f32 %v731_v56, %v667_v54  ;;  %v2476_v8 = vadd.f32 %v732_v58, %v668_v55  ;;  %v404_v9 = vsub.f32 %v2422_v59, %v286_v0  ;;  %v405_v10 = vsub.f32 %v2430_v1, %v286_v0  ;;  %1915 = vset.pattern.permute.xlu1 %v2191_v2  ;;  %v1311_v55 = vld [vmem:[%s3744_s2 + $0xd0] sm:$0xff]  ;;  %v1924_v56 = vpop.eup %1923 }
  0xa8   : > { %v607_v12 = vsub.f32 %v2418_v57, %v507_v6  ;;  %v608_v13 = vsub.f32 %v2425_v62, %v507_v6  ;;  %550 = vperm.xlu1 %1915, %v2338_v30   ;;  %1931 = vrsqrt.f32 %v2498_v31  ;;  %vm918_vm7 = vcmp.eq.f32.partialorder %v2489_v15, 0.0 }
  0xa9   : > { %v671_v17 = vmul.f32 %v404_v9, %v404_v9  ;;  %v672_v19 = vmul.f32 %v405_v10, %v405_v10  ;;  %1933 = vrsqrt.f32 %v2506_v43  ;;  %vm937_vm8 = vcmp.eq.f32.partialorder %v2498_v31, inf }
  0xaa   : > { %v735_v24 = vmul.f32 %v607_v12, %v607_v12  ;;  %v736_v26 = vmul.f32 %v608_v13, %v608_v13  ;;  %v296_v27 = vpop.permute.xlu1 %295  ;;  %1429 = vperm.xlu0 %1921, %v1307_v4   ;;  %v515_v28 = vpop.permute.xlu0 %514  ;;  %1935 = vrsqrt.f32 %v2474_v7  ;;  %vm939_vm9 = vcmp.eq.f32.partialorder %v2498_v31, 0.0 }
  0xab   : > { %v408_v34 = vsub.f32 %v2422_v59, %v296_v27  ;;  %v409_v35 = vsub.f32 %v2430_v1, %v296_v27  ;;  %v611_v38 = vsub.f32 %v2418_v57, %v515_v28  ;;  %v612_v30 = vsub.f32 %v2425_v62, %v515_v28 }
  0xac   : > { %v2500_v36 = vadd.f32 %v735_v24, %v671_v17  ;;  %v2502_v37 = vadd.f32 %v736_v26, %v672_v19  ;;  %554 = vperm.xlu1 %1915, %v2279_v16   ;;  %v1313_v19 = vld [vmem:[%s3744_s2 + $0xe0] sm:$0xff]  ;;  %1937 = vrsqrt.f32 %v2476_v8  ;;  %vm944_vm10 = vcmp.eq.f32.partialorder %v2506_v43, inf }
  0xad   : > { %v675_v39 = vmul.f32 %v408_v34, %v408_v34  ;;  %v676_v40 = vmul.f32 %v409_v35, %v409_v35  ;;  %v739_v41 = vmul.f32 %v611_v38, %v611_v38  ;;  %v740_v42 = vmul.f32 %v612_v30, %v612_v30  ;;  %v1926_v38 = vpop.eup %1925 }
  0xae   : > { %3761 = vst [vmem:[#allocation3_spill] sm:$0xff] %v2500_v36  ;;  %3762 = vst [vmem:[#allocation4_spill] sm:$0xff] %v2502_v37  ;;  %v306_v44 = vpop.permute.xlu1 %305  ;;  %1439 = vperm.xlu0 %1921, %v1309_v29   ;;  %v523_v46 = vpop.permute.xlu0 %522  ;;  %v581_v30 = vsub.f32 %v2418_v57, %v2406_v49  ;;  %v582_v29 = vsub.f32 %v2425_v62, %v2406_v49  ;;  %v880_v49 = vmul.f32 %v1924_v56, %v2447_v25 }
  0xaf   : > { %v2512_v20 = vadd.f32 %v739_v41, %v675_v39  ;;  %v2514_v16 = vadd.f32 %v740_v42, %v676_v40  ;;  %v412_v51 = vsub.f32 %v2422_v59, %v306_v44  ;;  %v413_v54 = vsub.f32 %v2430_v1, %v306_v44  ;;  %v1315_v42 = vld [vmem:[%s3744_s2 + $0xf0] sm:$0xff]  ;;  %v1928_v44 = vpop.eup %1927 }
  0xb0   : > { %v615_v58 = vsub.f32 %v2418_v57, %v523_v46  ;;  %v616_v61 = vsub.f32 %v2425_v62, %v523_v46  ;;  %1916 = vset.pattern.permute.xlu1 %v3747_v3  ;;  %v2560_v46 = vmul.f32 %v382_v21, %v382_v21  ;;  %v884_v56 = vand.u32 2147483648, %v2447_v25 }
  0xb1   : > { %3763 = vst [vmem:[#allocation5_spill] sm:$0xff] %v2512_v20  ;;  %3764 = vst [vmem:[#allocation6_spill] sm:$0xff] %v2514_v16  ;;  %v679_v63 = vmul.f32 %v412_v51, %v412_v51  ;;  %v680_v0 = vmul.f32 %v413_v54, %v413_v54  ;;  %1394 = vperm.xlu1 %1916, %v1300_v50   ;;  %v2562_v50 = vmul.f32 %v383_v23, %v383_v23  ;;  %v1930_v51 = vpop.eup %1929  ;;  %v1316_v16 = vld [vmem:[%s3744_s2 + $0xf8] sm:$0xff] }
  0xb2   : > { %v743_v6 = vmul.f32 %v615_v58, %v615_v58  ;;  %v744_v9 = vmul.f32 %v616_v61, %v616_v61  ;;  %v316_v10 = vpop.permute.xlu1 %315  ;;  %1449 = vperm.xlu0 %1921, %v1311_v55   ;;  %v531_v4 = vpop.permute.xlu0 %530  ;;  %v2567_v54 = vmul.f32 %v581_v30, %v581_v30  ;;  %v2569_v55 = vmul.f32 %v582_v29, %v582_v29 }
  0xb3   : > { %v416_v11 = vsub.f32 %v2422_v59, %v316_v10  ;;  %v417_v12 = vsub.f32 %v2430_v1, %v316_v10  ;;  %v619_v13 = vsub.f32 %v2418_v57, %v531_v4  ;;  %v620_v17 = vsub.f32 %v2425_v62, %v531_v4 }
  0xb4   : > { %v2541_v24 = vadd.f32 %v743_v6, %v679_v63  ;;  %v2543_v26 = vadd.f32 %v744_v9, %v680_v0  ;;  %v887_v61 = vmul.f32 %v1926_v38, %v2469_v60  ;;  %v1932_v63 = vpop.eup %1931  ;;  %v908_v6 = vmul.f32 %v1928_v44, %v2487_v14 }
  0xb5   : > { %v683_v27 = vmul.f32 %v416_v11, %v416_v11  ;;  %v684_v28 = vmul.f32 %v417_v12, %v417_v12  ;;  %v747_v34 = vmul.f32 %v619_v13, %v619_v13  ;;  %v748_v35 = vmul.f32 %v620_v17, %v620_v17  ;;  %1399 = vperm.xlu1 %1916, %v1301_v5   ;;  %v1934_v9 = vpop.eup %1933 }
  0xb6   : > { %v2549_v39 = vpop.permute.xlu1 %325  ;;  %v2551_v40 = vpop.permute.xlu0 %534  ;;  %1459 = vperm.xlu0 %1921, %v1313_v19   ;;  %v882_v10 = vsel %vm881_vm0, %v2447_v25, %v880_v49  ;;  %v912_v4 = vand.u32 2147483648, %v2487_v14  ;;  %v915_v5 = vmul.f32 %v1930_v51, %v2489_v15  ;;  %v889_v12 = vsel %vm888_vm2, %v2469_v60, %v887_v61 }
  0xb7   : > { %v2553_v48 = vadd.f32 %v747_v34, %v683_v27  ;;  %v2555_v41 = vadd.f32 %v748_v35, %v684_v28  ;;  %v919_v13 = vand.u32 2147483648, %v2489_v15  ;;  %v936_v17 = vmul.f32 %v1932_v63, %v2498_v31  ;;  %v1936_v44 = vpop.eup %1935 }
  0xb8   : > { %v910_v23 = vsel %vm909_vm4, %v2487_v14, %v908_v6  ;;  %v943_v27 = vmul.f32 %v1934_v9, %v2506_v43  ;;  %v2606_v28 = vsel %vm883_vm1, %v884_v56, %v882_v10  ;;  %v940_v34 = vand.u32 2147483648, %v2498_v31 }
  0xb9   : > { %3765 = vst [vmem:[#allocation7_spill] sm:$0xff] %v2553_v48  ;;  %3766 = vst [vmem:[#allocation8_spill] sm:$0xff] %v2555_v41  ;;  %1917 = vset.pattern.permute.xlu1 %v2191_v2  ;;  %v917_v38 = vsel %vm916_vm6, %v2489_v15, %v915_v5  ;;  %1939 = vrsqrt.f32 %v2464_v52  ;;  %v2624_v29 = vsel %vm911_vm5, %v912_v4, %v910_v23  ;;  %vm946_vm11 = vcmp.eq.f32.partialorder %v2506_v43, 0.0  ;;  %v1938_v23 = vpop.eup %1937 }
  0xba   : > { %v2571_v58 = vpop.permute.xlu1 %335  ;;  %562 = vperm.xlu1 %1917, %v2288_v18   ;;  %1469 = vperm.xlu0 %1921, %v1315_v42   ;;  %v891_v18 = vand.u32 2147483648, %v2469_v60  ;;  %v938_v42 = vsel %vm937_vm8, %v2498_v31, %v936_v17  ;;  %v945_v61 = vsel %vm944_vm10, %v2506_v43, %v943_v27  ;;  %v947_v63 = vand.u32 2147483648, %v2506_v43 }
  0xbb   : > { %v221_v0 = vpop.permute.xlu0 %220  ;;  %1941 = vrsqrt.f32 %v2466_v53  ;;  %v420_v60 = vsub.f32 %v2422_v59, %v2549_v39  ;;  %v421_v14 = vsub.f32 %v2430_v1, %v2549_v39  ;;  %v2642_v56 = vsel %vm918_vm7, %v919_v13, %v917_v38 }
  0xbc   : > { %v378_v19 = vsub.f32 %v2422_v59, %v221_v0  ;;  %v379_v35 = vsub.f32 %v2430_v1, %v221_v0  ;;  %v2620_v25 = vsel %vm890_vm3, %v891_v18, %v889_v12  ;;  %v1304_v0 = vld [vmem:[%s3744_s2 + $0x98] sm:$0xff]  ;;  %vm993_vm12 = vcmp.eq.f32.partialorder %v2474_v7, inf }
  0xbd   : > { %v621_v6 = vsub.f32 %v2418_v57, %v2551_v40  ;;  %v622_v9 = vsub.f32 %v2425_v62, %v2551_v40  ;;  %v2651_v39 = vsel %vm939_vm9, %v940_v34, %v938_v42  ;;  %v2657_v15 = vsel %vm946_vm11, %v947_v63, %v945_v61 }
  0xbe   : > { %v2588_v11 = vpop.permute.xlu1 %345  ;;  %566 = vperm.xlu1 %1917, %v2350_v32   ;;  %v1303_v32 = vld [vmem:[%s3744_s2 + $0x90] sm:$0xff]  ;;  %v645_v49 = vmul.f32 %v378_v19, %v378_v19  ;;  %v646_v18 = vmul.f32 %v379_v35, %v379_v35  ;;  %v992_v4 = vmul.f32 %v1936_v44, %v2474_v7  ;;  %vm995_vm13 = vcmp.eq.f32.partialorder %v2474_v7, 0.0 }
  0xbf   : > { %v2596_v21 = vpop.permute.xlu0 %225  ;;  %v996_v5 = vand.u32 2147483648, %v2474_v7  ;;  %v424_v40 = vsub.f32 %v2422_v59, %v2571_v58  ;;  %vm1000_vm14 = vcmp.eq.f32.partialorder %v2476_v8, inf  ;;  %1943 = vrsqrt.f32 %v2541_v24 }
  0xc0   : > { %v2665_v12 = vadd.f32 %v2567_v54, %v645_v49  ;;  %v2669_v43 = vmul.f32 %v420_v60, %v420_v60  ;;  %v2671_v13 = vmul.f32 %v421_v14, %v421_v14  ;;  %v425_v17 = vsub.f32 %v2430_v1, %v2571_v58 }
  0xc1   : > { %v2676_v27 = vmul.f32 %v621_v6, %v621_v6  ;;  %v2678_v54 = vmul.f32 %v622_v9, %v622_v9  ;;  %vm965_vm15 = vcmp.eq.f32.partialorder %v2464_v52, inf  ;;  %v428_v34 = vsub.f32 %v2422_v59, %v2588_v11 }
  0xc2   : > { %v356_v30 = vpop.permute.xlu1 %355  ;;  %1919 = vset.pattern.permute.xlu1 %v3747_v3  ;;  %3767 = vst [vmem:[#allocation9_spill] sm:$0xff] %v2669_v43  ;;  %3768 = vst [vmem:[#allocation10_spill] sm:$0xff] %v2671_v13  ;;  %v429_v35 = vsub.f32 %v2430_v1, %v2588_v11  ;;  %v380_v58 = vsub.f32 %v2422_v59, %v2596_v21  ;;  %v994_v42 = vsel %vm993_vm12, %v2474_v7, %v992_v4 }
  0xc3   : > { %1409 = vperm.xlu1 %1919, %v1303_v32   ;;  %v2628_v51 = vpop.permute.xlu0 %240  ;;  %v2681_v32 = vadd.f32 %v2569_v55, %v646_v18  ;;  %vm1002_vm0 = vcmp.eq.f32.partialorder %v2476_v8, 0.0  ;;  %v1940_v55 = vpop.eup %1939  ;;  %v2696_v44 = vmul.f32 %v424_v40, %v424_v40  ;;  %v381_v49 = vsub.f32 %v2430_v1, %v2596_v21 }
  0xc4   : > { %1945 = vrsqrt.f32 %v2665_v12  ;;  %v968_v61 = vand.u32 2147483648, %v2464_v52  ;;  %v2705_v63 = vmul.f32 %v425_v17, %v425_v17  ;;  %v432_v60 = vsub.f32 %v2422_v59, %v356_v30 }
  0xc5   : > { %3769 = vst [vmem:[#allocation11_spill] sm:$0xff] %v2696_v44  ;;  %v999_v14 = vmul.f32 %v1938_v23, %v2476_v8  ;;  %vm967_vm1 = vcmp.eq.f32.partialorder %v2464_v52, 0.0  ;;  %vm972_vm2 = vcmp.eq.f32.partialorder %v2466_v53, inf  ;;  %v1942_v21 = vpop.eup %1941  ;;  %1947 = vrsqrt.f32 %v2681_v32 }
  0xc6   : > { %v2653_v10 = vpop.permute.xlu1 %365  ;;  %3770 = vst [vmem:[#allocation12_spill] sm:$0xff] %v2705_v63  ;;  %v975_v6 = vand.u32 2147483648, %v2466_v53  ;;  %v2719_v9 = vmul.f32 %v428_v34, %v428_v34  ;;  %v647_v18 = vmul.f32 %v380_v58, %v380_v58  ;;  %v964_v4 = vmul.f32 %v1940_v55, %v2464_v52 }
  0xc7   : > { %1414 = vperm.xlu1 %1919, %v1304_v0   ;;  %v251_v31 = vpop.permute.xlu0 %250  ;;  %v2716_v0 = vsel %vm995_vm13, %v996_v5, %v994_v42  ;;  %vm974_vm3 = vcmp.eq.f32.partialorder %v2466_v53, 0.0  ;;  %v2725_v40 = vmul.f32 %v381_v49, %v381_v49  ;;  %v387_v7 = vsub.f32 %v2430_v1, %v2628_v51 }
  0xc8   : > { %3771 = vst [vmem:[#allocation13_spill] sm:$0xff] %v2719_v9  ;;  %vm1077_vm4 = vcmp.eq.f32.partialorder %v2541_v24, inf  ;;  %v2735_v34 = vmul.f32 %v432_v60, %v432_v60  ;;  %v1001_v58 = vsel %vm1000_vm14, %v2476_v8, %v999_v14  ;;  %v971_v42 = vmul.f32 %v1942_v21, %v2466_v53  ;;  %v1306_v14 = vld [vmem:[%s3744_s2 + $0xa8] sm:$0xff] }
  0xc9   : > { %v436_v49 = vsub.f32 %v2422_v59, %v2653_v10  ;;  %v437_v60 = vsub.f32 %v2430_v1, %v2653_v10  ;;  %v390_v45 = vsub.f32 %v2422_v59, %v251_v31  ;;  %v391_v23 = vsub.f32 %v2430_v1, %v251_v31 }
  0xca   : > { %v2690_v38 = vpop.permute.xlu1 %375  ;;  %3773 = vst [vmem:[#allocation15_spill] sm:$0xff] %v2735_v34  ;;  %v966_v21 = vsel %vm965_vm15, %v2464_v52, %v964_v4  ;;  %v2760_v19 = vmul.f32 %v387_v7, %v387_v7  ;;  %vm839_vm5 = vcmp.eq.f32.partialorder %v2665_v12, inf  ;;  %v3776_v4 = vmov 0  }
  0xcb   : > { %1920 = vset.pattern.permute.xlu1 %v2191_v2  ;;  %v2701_v11 = vpop.permute.xlu0 %260  ;;  %v433_v2 = vsub.f32 %v2430_v1, %v356_v30  ;;  %v386_v30 = vsub.f32 %v2422_v59, %v2628_v51  ;;  %v1944_v51 = vpop.eup %1943  ;;  %vm1079_vm6 = vcmp.eq.f32.partialorder %v2541_v24, 0.0  ;;  %v2779_v31 = vmul.f32 %v436_v49, %v436_v49  ;;  %v1308_v49 = vld [vmem:[%s3744_s2 + $0xb8] sm:$0xff] }
  0xcc   : > { %574 = vperm.xlu1 %1920, %v2356_v33   ;;  %v2721_v33 = vmul.f32 %v429_v35, %v429_v35  ;;  %v1076_v7 = vmul.f32 %v1944_v51, %v2541_v24  ;;  %vm846_vm7 = vcmp.eq.f32.partialorder %v2681_v32, inf  ;;  %vm841_vm8 = vcmp.eq.f32.partialorder %v2665_v12, 0.0 }
  0xcd   : > { %v2743_v55 = vmul.f32 %v433_v2, %v433_v2  ;;  %v2758_v2 = vmul.f32 %v386_v30, %v386_v30  ;;  %v973_v30 = vsel %vm972_vm2, %v2466_v53, %v971_v42  ;;  %3777 = vst [vmem:[#allocation17_spill] sm:$0xff] %v2779_v31  ;;  %v2791_v42 = vmul.f32 %v391_v23, %v391_v23 }
  0xce   : > { %3772 = vst [vmem:[#allocation14_spill] sm:$0xff] %v2721_v33  ;;  %v1946_v34 = vpop.eup %1945  ;;  %v2781_v33 = vmul.f32 %v437_v60, %v437_v60  ;;  %v441_v52 = vsub.f32 %v2430_v1, %v2690_v38  ;;  %vm848_vm9 = vcmp.eq.f32.partialorder %v2681_v32, 0.0  ;;  %1949 = vrsqrt.f32 %v2543_v26 }
  0xcf   : > { %v459_v5 = vpop.permute.xlu1 %458  ;;  %v2731_v17 = vpop.permute.xlu0 %270  ;;  %3774 = vst [vmem:[#allocation16_spill] sm:$0xff] %v2743_v55 }
  0xd0   : > { %v583_v35 = vsub.f32 %v2418_v57, %v459_v5  ;;  %578 = vperm.xlu1 %1920, %v2306_v22   ;;  %v584_v22 = vsub.f32 %v2425_v62, %v459_v5  ;;  %v3775_v5 = vand.u32 2147483648, %v2476_v8  ;;  %3778 = vst [vmem:[#allocation18_spill] sm:$0xff] %v2781_v33  ;;  %v1948_v60 = vpop.eup %1947 }
  0xd2   : > { %v711_v3 = vmul.f32 %v583_v35, %v583_v35  ;;  %v2770_v35 = vsel %vm1002_vm0, %v3775_v5, %v1001_v58  ;;  %v2787_v58 = vsel %vm967_vm1, %v968_v61, %v966_v21  ;;  %v2789_v5 = vmul.f32 %v390_v45, %v390_v45 }
  0xd3   : > { %v463_v10 = vpop.permute.xlu1 %462  ;;  %v2762_v47 = vpop.permute.xlu0 %280  ;;  %v712_v51 = vmul.f32 %v584_v22, %v584_v22  ;;  %v394_v45 = vsub.f32 %v2422_v59, %v2701_v11  ;;  %v838_v22 = vmul.f32 %v1946_v34, %v2665_v12  ;;  %v1078_v21 = vsel %vm1077_vm4, %v2541_v24, %v1076_v7  ;;  %v1310_v34 = vld [vmem:[%s3744_s2 + $0xc8] sm:$0xff] }
  0xd4   : > { %v585_v55 = vsub.f32 %v2418_v57, %v463_v10  ;;  %1922 = vset.pattern.permute.xlu1 %v3776_v4  ;;  %v586_v8 = vsub.f32 %v2425_v62, %v463_v10  ;;  %v2793_v4 = vadd.f32 %v711_v3, %v647_v18  ;;  %v2807_v3 = vsel %vm974_vm3, %v975_v6, %v973_v30 }
  0xd5   : > { %1424 = vperm.xlu1 %1922, %v1306_v14   ;;  %v440_v14 = vsub.f32 %v2422_v59, %v2690_v38  ;;  %v1080_v38 = vand.u32 2147483648, %v2541_v24  ;;  %v395_v10 = vsub.f32 %v2430_v1, %v2701_v11  ;;  %v2820_v53 = vadd.f32 %v712_v51, %v2725_v40 }
  0xd6   : > { %v713_v18 = vmul.f32 %v585_v55, %v585_v55  ;;  %v714_v9 = vmul.f32 %v586_v8, %v586_v8  ;;  %v845_v55 = vmul.f32 %v1948_v60, %v2681_v32  ;;  %1951 = vrsqrt.f32 %v2793_v4 }
  0xd7   : > { %v471_v61 = vpop.permute.xlu1 %470  ;;  %v291_v23 = vpop.permute.xlu0 %290  ;;  %v2828_v11 = vmul.f32 %v440_v14, %v440_v14  ;;  %v2830_v30 = vmul.f32 %v441_v52, %v441_v52  ;;  %v2832_v7 = vmul.f32 %v394_v45, %v394_v45  ;;  %v2836_v40 = vsel %vm1079_vm6, %v1080_v38, %v1078_v21 }
  0xd8   : > { %v589_v41 = vsub.f32 %v2418_v57, %v471_v61  ;;  %v590_v6 = vsub.f32 %v2425_v62, %v471_v61  ;;  %3781 = vst [vmem:[#allocation21_spill] sm:$0xff] %v2836_v40  ;;  %v398_v51 = vsub.f32 %v2422_v59, %v2731_v17  ;;  %v399_v60 = vsub.f32 %v2430_v1, %v2731_v17  ;;  %v1312_v17 = vld [vmem:[%s3744_s2 + $0xd8] sm:$0xff] }
  0xd9   : > { %1434 = vperm.xlu1 %1922, %v1308_v49   ;;  %3779 = vst [vmem:[#allocation19_spill] sm:$0xff] %v2828_v11  ;;  %3780 = vst [vmem:[#allocation20_spill] sm:$0xff] %v2830_v30  ;;  %v2843_v61 = vadd.f32 %v713_v18, %v2560_v46  ;;  %v840_v14 = vsel %vm839_vm5, %v2665_v12, %v838_v22  ;;  %v2848_v52 = vmul.f32 %v395_v10, %v395_v10 }
  0xda   : > { %v2851_v45 = vadd.f32 %v714_v9, %v2562_v50  ;;  %v717_v24 = vmul.f32 %v589_v41, %v589_v41  ;;  %1953 = vrsqrt.f32 %v2500_v36  ;;  %v718_v21 = vmul.f32 %v590_v6, %v590_v6 }
  0xdb   : > { %v479_v8 = vpop.permute.xlu1 %478  ;;  %v301_v49 = vpop.permute.xlu0 %300  ;;  %v847_v46 = vsel %vm846_vm7, %v2681_v32, %v845_v55  ;;  %1955 = vrsqrt.f32 %v2820_v53  ;;  %v402_v50 = vsub.f32 %v2422_v59, %v2762_v47  ;;  %v3782_v22 = vand.u32 2147483648, %v2665_v12 }
  0xdc   : > { %1957 = vrsqrt.f32 %v2502_v37  ;;  %v2872_v6 = vmul.f32 %v398_v51, %v398_v51  ;;  %v403_v55 = vsub.f32 %v2430_v1, %v2762_v47  ;;  %v2880_v18 = vadd.f32 %v717_v24, %v2758_v2  ;;  %v1314_v2 = vld [vmem:[%s3744_s2 + $0xe8] sm:$0xff] }
  0xdd   : > { %1444 = vperm.xlu1 %1922, %v1310_v34   ;;  %v2868_v38 = vsel %vm841_vm8, %v3782_v22, %v840_v14  ;;  %v2874_v34 = vmul.f32 %v399_v60, %v399_v60  ;;  %1959 = vrsqrt.f32 %v2843_v61  ;;  %v406_v12 = vsub.f32 %v2422_v59, %v291_v23 }
  0xde   : > { %v3783_v14 = vand.u32 2147483648, %v2681_v32  ;;  %1961 = vrsqrt.f32 %v2851_v45  ;;  %v2891_v51 = vadd.f32 %v718_v21, %v2760_v19  ;;  %v593_v47 = vsub.f32 %v2418_v57, %v479_v8 }
  0xdf   : > { %v487_v41 = vpop.permute.xlu1 %486  ;;  %v311_v9 = vpop.permute.xlu0 %310  ;;  %v594_v60 = vsub.f32 %v2425_v62, %v479_v8  ;;  %v2901_v32 = vmul.f32 %v402_v50, %v402_v50  ;;  %vm853_vm10 = vcmp.eq.f32.partialorder %v2793_v4, inf  ;;  %1963 = vrsqrt.f32 %v2512_v20 }
  0xe0   : > { %v2887_v22 = vsel %vm848_vm9, %v3783_v14, %v847_v46  ;;  %v407_v46 = vsub.f32 %v2430_v1, %v291_v23  ;;  %v2906_v8 = vmul.f32 %v403_v55, %v403_v55  ;;  %v597_v21 = vsub.f32 %v2418_v57, %v487_v41 }
  0xe1   : > { %1454 = vperm.xlu1 %1922, %v1312_v17   ;;  %v2899_v17 = vpop.eup %1949  ;;  %v856_v30 = vand.u32 2147483648, %v2793_v4  ;;  %v2911_v11 = vmul.f32 %v406_v12, %v406_v12  ;;  %v410_v50 = vsub.f32 %v2422_v59, %v301_v49  ;;  %v411_v23 = vsub.f32 %v2430_v1, %v301_v49 }
  0xe2   : > { %v1952_v19 = vpop.eup %1951  ;;  %vm855_vm11 = vcmp.eq.f32.partialorder %v2793_v4, 0.0  ;;  %1965 = vrsqrt.f32 %v2880_v18  ;;  %v721_v48 = vmul.f32 %v593_v47, %v593_v47  ;;  %v722_v55 = vmul.f32 %v594_v60, %v594_v60 }
  0xe3   : > { %v495_v14 = vpop.permute.xlu1 %494  ;;  %v321_v10 = vpop.permute.xlu0 %320  ;;  %v598_v33 = vsub.f32 %v2425_v62, %v487_v41  ;;  %vm860_vm12 = vcmp.eq.f32.partialorder %v2820_v53, inf  ;;  %1967 = vrsqrt.f32 %v2891_v51  ;;  %v2925_v49 = vmul.f32 %v407_v46, %v407_v46 }
  0xe4   : > { %v2923_v12 = vpop.eup %1953  ;;  %v602_v24 = vsub.f32 %v2425_v62, %v495_v14  ;;  %v852_v41 = vmul.f32 %v1952_v19, %v2793_v4  ;;  %v725_v31 = vmul.f32 %v597_v21, %v597_v21  ;;  %v414_v63 = vsub.f32 %v2422_v59, %v311_v9 }
  0xe5   : > { %1464 = vperm.xlu1 %1922, %v1314_v2   ;;  %3784 = vst [vmem:[#allocation22_spill] sm:$0xff] %v2923_v12  ;;  %v601_v2 = vsub.f32 %v2418_v57, %v495_v14  ;;  %v1956_v20 = vpop.eup %1955  ;;  %v415_v44 = vsub.f32 %v2430_v1, %v311_v9  ;;  %vm867_vm13 = vcmp.eq.f32.partialorder %v2843_v61, inf  ;;  %v2936_v13 = vmul.f32 %v410_v50, %v410_v50 }
  0xe6   : > { %v2934_v46 = vpop.eup %1957  ;;  %v2938_v43 = vmul.f32 %v411_v23, %v411_v23  ;;  %v418_v14 = vsub.f32 %v2422_v59, %v321_v10  ;;  %vm874_vm14 = vcmp.eq.f32.partialorder %v2851_v45, inf  ;;  %v2944_v9 = vadd.f32 %v721_v48, %v2789_v5 }
  0xe7   : > { %v503_v47 = vpop.permute.xlu1 %502  ;;  %v331_v60 = vpop.permute.xlu0 %330  ;;  %3785 = vst [vmem:[#allocation23_spill] sm:$0xff] %v2934_v46  ;;  %v2947_v37 = vadd.f32 %v722_v55, %v2791_v42  ;;  %v726_v12 = vmul.f32 %v598_v33, %v598_v33  ;;  %v419_v50 = vsub.f32 %v2430_v1, %v321_v10  ;;  %vm862_vm15 = vcmp.eq.f32.partialorder %v2820_v53, 0.0 }
  0xe8   : > { %v1960_v21 = vpop.eup %1959  ;;  %v729_v46 = vmul.f32 %v601_v2, %v601_v2  ;;  %v730_v36 = vmul.f32 %v602_v24, %v602_v24  ;;  %v854_v19 = vsel %vm853_vm10, %v2793_v4, %v852_v41  ;;  %v859_v48 = vmul.f32 %v1956_v20, %v2820_v53 }
  0xe9   : > { %1474 = vperm.xlu1 %1922, %v1316_v16   ;;  %v1962_v23 = vpop.eup %1961  ;;  %v2956_v5 = vadd.f32 %v725_v31, %v2832_v7  ;;  %v2958_v42 = vmul.f32 %v414_v63, %v414_v63  ;;  %v2960_v33 = vmul.f32 %v415_v44, %v415_v44  ;;  %vm869_vm0 = vcmp.eq.f32.partialorder %v2843_v61, 0.0 }
  0xea   : > { %vm876_vm1 = vcmp.eq.f32.partialorder %v2851_v45, 0.0  ;;  %v2965_v24 = vpop.eup %1963  ;;  %v685_v55 = vmul.f32 %v418_v14, %v418_v14  ;;  %v605_v2 = vsub.f32 %v2418_v57, %v503_v47  ;;  %v606_v20 = vsub.f32 %v2425_v62, %v503_v47 }
  0xeb   : > { %v511_v16 = vpop.permute.xlu1 %510  ;;  %v341_v40 = vpop.permute.xlu0 %340  ;;  %3786 = vst [vmem:[#allocation24_spill] sm:$0xff] %v2960_v33  ;;  %3787 = vst [vmem:[#allocation25_spill] sm:$0xff] %v2965_v24  ;;  %v866_v31 = vmul.f32 %v1960_v21, %v2843_v61  ;;  %vm895_vm2 = vcmp.eq.f32.partialorder %v2880_v18, inf  ;;  %v2972_v44 = vadd.f32 %v726_v12, %v2848_v52  ;;  %v686_v63 = vmul.f32 %v419_v50, %v419_v50 }
  0xec   : > { %v2976_v7 = vsel %vm855_vm11, %v856_v30, %v854_v19  ;;  %v873_v41 = vmul.f32 %v1962_v23, %v2851_v45  ;;  %v1966_v10 = vpop.eup %1965  ;;  %v2980_v14 = vadd.f32 %v729_v46, %v2872_v6  ;;  %v2983_v47 = vadd.f32 %v730_v36, %v2874_v34 }
  0xed   : > { %v861_v52 = vsel %vm860_vm12, %v2820_v53, %v859_v48  ;;  %vm902_vm3 = vcmp.eq.f32.partialorder %v2891_v51, inf  ;;  %v1968_v4 = vpop.eup %1967  ;;  %v422_v30 = vsub.f32 %v2422_v59, %v331_v60  ;;  %v423_v12 = vsub.f32 %v2430_v1, %v331_v60 }
  0xee   : > { %v609_v19 = vsub.f32 %v2418_v57, %v511_v16  ;;  %v610_v6 = vsub.f32 %v2425_v62, %v511_v16  ;;  %vm897_vm4 = vcmp.eq.f32.partialorder %v2880_v18, 0.0  ;;  %v2995_v36 = vadd.f32 %v2676_v27, %v685_v55 }
  0xef   : > { %v519_v21 = vpop.permute.xlu1 %518  ;;  %v351_v24 = vpop.permute.xlu0 %350  ;;  %v733_v34 = vmul.f32 %v605_v2, %v605_v2  ;;  %v734_v46 = vmul.f32 %v606_v20, %v606_v20  ;;  %v868_v50 = vsel %vm867_vm13, %v2843_v61, %v866_v31  ;;  %v426_v23 = vsub.f32 %v2422_v59, %v341_v40 }
  0xf0   : > { %3788 = vst [vmem:[#allocation26_spill] sm:$0xff] %v2995_v36  ;;  %v875_v60 = vsel %vm874_vm14, %v2851_v45, %v873_v41  ;;  %v894_v48 = vmul.f32 %v1966_v10, %v2880_v18  ;;  %1969 = vrsqrt.f32 %v2944_v9  ;;  %v3007_v16 = vadd.f32 %v2678_v54, %v686_v63 }
  0xf1   : > { %v427_v27 = vsub.f32 %v2430_v1, %v341_v40  ;;  %v3790_v20 = vand.u32 2147483648, %v2820_v53  ;;  %v901_v41 = vmul.f32 %v1968_v4, %v2891_v51  ;;  %v3019_v36 = vmul.f32 %v422_v30, %v422_v30 }
  0xf2   : > { %3789 = vst [vmem:[#allocation27_spill] sm:$0xff] %v3007_v16  ;;  %v3021_v10 = vmul.f32 %v423_v12, %v423_v12  ;;  %v737_v33 = vmul.f32 %v609_v19, %v609_v19  ;;  %v738_v54 = vmul.f32 %v610_v6, %v610_v6  ;;  %v3024_v63 = vadd.f32 %v733_v34, %v2901_v32 }
  0xf3   : > { %v3010_v55 = vpop.permute.xlu1 %526  ;;  %v3012_v2 = vpop.permute.xlu0 %360  ;;  %v864_v31 = vsel %vm862_vm15, %v3790_v20, %v861_v52  ;;  %v3027_v40 = vadd.f32 %v734_v46, %v2906_v8  ;;  %v3791_v16 = vand.u32 2147483648, %v2843_v61  ;;  %v3792_v52 = vand.u32 2147483648, %v2851_v45 }
  0xf4   : > { %v3037_v30 = vmul.f32 %v426_v23, %v426_v23  ;;  %v613_v12 = vsub.f32 %v2418_v57, %v519_v21  ;;  %v896_v32 = vsel %vm895_vm2, %v2880_v18, %v894_v48  ;;  %vm904_vm5 = vcmp.eq.f32.partialorder %v2891_v51, 0.0 }
  0xf5   : > { %v871_v53 = vsel %vm869_vm0, %v3791_v16, %v868_v50  ;;  %v878_v4 = vsel %vm876_vm1, %v3792_v52, %v875_v60  ;;  %v3044_v8 = vmul.f32 %v427_v27, %v427_v27  ;;  %v903_v61 = vsel %vm902_vm3, %v2891_v51, %v901_v41 }
  0xf6   : > { %v905_v45 = vand.u32 2147483648, %v2891_v51  ;;  %1971 = vrsqrt.f32 %v2947_v37  ;;  %v3054_v6 = vadd.f32 %v737_v33, %v2911_v11  ;;  %v3057_v34 = vadd.f32 %v738_v54, %v2925_v49 }
  0xf7   : > { %v3046_v19 = vpop.permute.xlu0 %370  ;;  %v3060_v46 = vsub.f32 %v2425_v62, %v519_v21  ;;  %v3063_v50 = vsub.f32 %v2422_v59, %v351_v24  ;;  %v3066_v60 = vsub.f32 %v2430_v1, %v351_v24  ;;  %v3793_v11 = vand.u32 2147483648, %v2880_v18 }
  0xf8   : > { %v1320_v23 = vpop.permute.xlu1 %1319  ;;  %v3074_v33 = vmul.f32 %v613_v12, %v613_v12  ;;  %v906_v21 = vsel %vm904_vm5, %v905_v45, %v903_v61  ;;  %vm923_vm6 = vcmp.eq.f32.partialorder %v2944_v9, inf  ;;  %vm925_vm7 = vcmp.eq.f32.partialorder %v2944_v9, 0.0 }
  0xf9   : > { %v1477_v48 = vadd.f32 %v1320_v23, %v2868_v38  ;;  %v1478_v16 = vadd.f32 %v1320_v23, %v2887_v22  ;;  %v899_v49 = vsel %vm897_vm4, %v3793_v11, %v896_v32  ;;  %v926_v38 = vand.u32 2147483648, %v2944_v9 }
  0xfa   : > { %1973 = vrsqrt.f32 %v2956_v5  ;;  %v1970_v22 = vpop.eup %1969  ;;  %v933_v52 = vand.u32 2147483648, %v2947_v37  ;;  %vm930_vm8 = vcmp.eq.f32.partialorder %v2947_v37, inf  ;;  %vm932_vm9 = vcmp.eq.f32.partialorder %v2947_v37, 0.0 }
  0xfb   : > { %v1541_v24 = vmul.f32 -20.0, %v1477_v48  ;;  %v1542_v27 = vmul.f32 -20.0, %v1478_v16  ;;  %v1325_v20 = vpop.permute.xlu0 %1324  ;;  %1975 = vrsqrt.f32 %v2972_v44  ;;  %v922_v48 = vmul.f32 %v1970_v22, %v2944_v9 }
  0xfc   : > { %v1479_v18 = vadd.f32 %v1325_v20, %v2976_v7  ;;  %v1480_v41 = vadd.f32 %v1325_v20, %v864_v31  ;;  %v1330_v54 = vpop.permute.xlu1 %1329  ;;  %1977 = vrsqrt.f32 %v3054_v6  ;;  %v954_v11 = vand.u32 2147483648, %v2956_v5 }
  0xfd   : > { %v1605_v51 = vmul.f32 1.442695, %v1541_v24  ;;  %v1607_v12 = vmul.f32 1.442695, %v1542_v27  ;;  %v1481_v32 = vadd.f32 %v1330_v54, %v871_v53  ;;  %v1482_v61 = vadd.f32 %v1330_v54, %v878_v4 }
  0xfe   : > { %v1543_v45 = vmul.f32 -20.0, %v1479_v18  ;;  %v1544_v23 = vmul.f32 -20.0, %v1480_v41  ;;  %vm951_vm10 = vcmp.eq.f32.partialorder %v2956_v5, inf  ;;  %vm953_vm11 = vcmp.eq.f32.partialorder %v2956_v5, 0.0 }
  0xff   : > { %1979 = vpow2.f32 %v1605_v51  ;;  %v1545_v7 = vmul.f32 -20.0, %v1481_v32  ;;  %v1546_v31 = vmul.f32 -20.0, %v1482_v61  ;;  %v1340_v16 = vpop.permute.xlu0 %1339  ;;  %vm958_vm12 = vcmp.eq.f32.partialorder %v2972_v44, inf }
 0x100   : > { %1981 = vpow2.f32 %v1607_v12  ;;  %v1609_v24 = vmul.f32 1.442695, %v1543_v45  ;;  %v1611_v53 = vmul.f32 1.442695, %v1544_v23  ;;  %v1485_v4 = vadd.f32 %v1340_v16, %v899_v49  ;;  %v1335_v27 = vpop.permute.xlu1 %1334  ;;  %v1972_v20 = vpop.eup %1971 }
 0x101   : > { %v1613_v18 = vmul.f32 1.442695, %v1545_v7  ;;  %v1615_v41 = vmul.f32 1.442695, %v1546_v31  ;;  %v1486_v54 = vadd.f32 %v1340_v16, %v906_v21  ;;  %v1483_v22 = vadd.f32 %v1335_v27, %v2606_v28 }
 0x102   : > { %1983 = vpow2.f32 %v1609_v24  ;;  %v1549_v51 = vmul.f32 -20.0, %v1485_v4  ;;  %v1484_v32 = vadd.f32 %v1335_v27, %v2620_v25  ;;  %v924_v12 = vsel %vm923_vm6, %v2944_v9, %v922_v48 }
 0x103   : > { %1985 = vpow2.f32 %v1611_v53  ;;  %v1550_v49 = vmul.f32 -20.0, %v1486_v54  ;;  %v1547_v61 = vmul.f32 -20.0, %v1483_v22  ;;  %v1350_v21 = vpop.permute.xlu0 %1349  ;;  %v927_v28 = vsel %vm925_vm7, %v926_v38, %v924_v12 }
 0x104   : > { %vm960_vm13 = vcmp.eq.f32.partialorder %v2972_v44, 0.0  ;;  %1987 = vpow2.f32 %v1613_v18  ;;  %v1621_v45 = vmul.f32 1.442695, %v1549_v51  ;;  %v1548_v25 = vmul.f32 -20.0, %v1484_v32  ;;  %v1345_v7 = vpop.permute.xlu1 %1344  ;;  %v1974_v48 = vpop.eup %1973 }
 0x105   : > { %v929_v23 = vmul.f32 %v1972_v20, %v2947_v37  ;;  %1989 = vpow2.f32 %v1615_v41  ;;  %v1623_v31 = vmul.f32 1.442695, %v1550_v49  ;;  %v1617_v16 = vmul.f32 1.442695, %v1547_v61  ;;  %v1976_v53 = vpop.eup %1975 }
 0x106   : > { %v1489_v24 = vadd.f32 %v1350_v21, %v927_v28  ;;  %1991 = vpow2.f32 %v1621_v45  ;;  %v1619_v4 = vmul.f32 1.442695, %v1548_v25  ;;  %v1487_v38 = vadd.f32 %v1345_v7, %v2624_v29  ;;  %v1978_v41 = vpop.eup %1977 }
 0x107   : > { %v931_v9 = vsel %vm930_vm8, %v2947_v37, %v929_v23  ;;  %1993 = vpow2.f32 %v1623_v31  ;;  %v1488_v18 = vadd.f32 %v1345_v7, %v2642_v56  ;;  %v1360_v51 = vpop.permute.xlu0 %1359  ;;  %v950_v32 = vmul.f32 %v1974_v48, %v2956_v5 }
 0x108   : > { %v934_v27 = vsel %vm932_vm9, %v933_v52, %v931_v9  ;;  %v1553_v20 = vmul.f32 -20.0, %v1489_v24  ;;  %1995 = vpow2.f32 %v1617_v16  ;;  %v1551_v22 = vmul.f32 -20.0, %v1487_v38  ;;  %v1355_v12 = vpop.permute.xlu1 %1354 }
 0x109   : > { %v1490_v54 = vadd.f32 %v1350_v21, %v934_v27  ;;  %v1980_v49 = vpop.eup %1979  ;;  %1997 = vpow2.f32 %v1619_v4  ;;  %v1552_v61 = vmul.f32 -20.0, %v1488_v18  ;;  %v957_v29 = vmul.f32 %v1976_v53, %v2972_v44 }
 0x10a   : > { %v961_v28 = vand.u32 2147483648, %v2972_v44  ;;  %v1982_v37 = vpop.eup %1981  ;;  %v1625_v45 = vmul.f32 1.442695, %v1551_v22  ;;  %v952_v56 = vsel %vm951_vm10, %v2956_v5, %v950_v32  ;;  %v1491_v21 = vadd.f32 %v1355_v12, %v2651_v39 }
 0x10b   : > { %v1554_v52 = vmul.f32 -20.0, %v1490_v54  ;;  %v1629_v25 = vmul.f32 1.442695, %v1553_v20  ;;  %v1627_v23 = vmul.f32 1.442695, %v1552_v61  ;;  %v955_v7 = vsel %vm953_vm11, %v954_v11, %v952_v56  ;;  %v1375_v22 = vpop.permute.xlu0 %1374 }
 0x10c   : > { %v959_v48 = vsel %vm958_vm12, %v2972_v44, %v957_v29  ;;  %v1984_v31 = vpop.eup %1983  ;;  %1999 = vpow2.f32 %v1625_v45  ;;  %v1493_v53 = vadd.f32 %v1360_v51, %v955_v7  ;;  %v1492_v38 = vadd.f32 %v1355_v12, %v2657_v15  ;;  %v1365_v27 = vpop.permute.xlu1 %1364 }
 0x10d   : > { %v1631_v16 = vmul.f32 1.442695, %v1554_v52  ;;  %v962_v24 = vsel %vm960_vm13, %v961_v28, %v959_v48  ;;  %v1986_v4 = vpop.eup %1985  ;;  %v1733_v39 = vadd.f32 %v1984_v31, %v1980_v49  ;;  %2001 = vpow2.f32 %v1627_v23 }
 0x10e   : > { %v1494_v9 = vadd.f32 %v1360_v51, %v962_v24  ;;  %v1988_v5 = vpop.eup %1987  ;;  %v3128_v11 = vmul.f32 %v3060_v46, %v3060_v46  ;;  %v1770_v20 = vadd.f32 %v1986_v4, %v1982_v37  ;;  %v1557_v18 = vmul.f32 -20.0, %v1493_v53 }
 0x10f   : > { %v1555_v54 = vmul.f32 -20.0, %v1491_v21  ;;  %v1990_v32 = vpop.eup %1989  ;;  %v3132_v44 = vmul.f32 %v3063_v50, %v3063_v50  ;;  %v1734_v49 = vadd.f32 %v1988_v5, %v1733_v39  ;;  %v1556_v51 = vmul.f32 -20.0, %v1492_v38  ;;  %v3147_v39 = vpop.permute.xlu0 %1389 }
 0x110   : > { %v1558_v61 = vmul.f32 -20.0, %v1494_v9  ;;  %v1992_v29 = vpop.eup %1991  ;;  %v617_v15 = vsub.f32 %v2418_v57, %v3010_v55  ;;  %v1771_v12 = vadd.f32 %v1990_v32, %v1770_v20  ;;  %2003 = vpow2.f32 %v1629_v25 }
 0x111   : > { %v1633_v46 = vmul.f32 1.442695, %v1555_v54  ;;  %v1994_v28 = vpop.eup %1993  ;;  %v618_v37 = vsub.f32 %v2425_v62, %v3010_v55  ;;  %2005 = vpow2.f32 %v1631_v16  ;;  %v1635_v52 = vmul.f32 1.442695, %v1556_v51  ;;  %v3144_v55 = vpop.permute.xlu1 %1369 }
 0x112   : > { %v1495_v45 = vadd.f32 %v1365_v27, %v2787_v58  ;;  %v1996_v50 = vpop.eup %1995  ;;  %v434_v56 = vsub.f32 %v2422_v59, %v3012_v2  ;;  %v1637_v21 = vmul.f32 1.442695, %v1557_v18  ;;  %v1499_v23 = vadd.f32 %v1375_v22, %v2716_v0 }
 0x113   : > { %v1496_v7 = vadd.f32 %v1365_v27, %v2807_v3  ;;  %v1998_v48 = vpop.eup %1997  ;;  %v1735_v25 = vadd.f32 %v1996_v50, %v1734_v49  ;;  %v1639_v31 = vmul.f32 1.442695, %v1558_v61  ;;  %v1034_v53 = vmul.f32 %v1978_v41, %v3054_v6 }
 0x114   : > { %v1559_v24 = vmul.f32 -20.0, %v1495_v45  ;;  %v1772_v16 = vadd.f32 %v1998_v48, %v1771_v12  ;;  %2007 = vpow2.f32 %v1633_v46  ;;  %v1500_v58 = vadd.f32 %v1375_v22, %v2770_v35 }
 0x115   : > { %v1560_v4 = vmul.f32 -20.0, %v1496_v7  ;;  %v435_v0 = vsub.f32 %v2430_v1, %v3012_v2  ;;  %v1736_v9 = vadd.f32 %v1992_v29, %v1735_v25  ;;  %2009 = vpow2.f32 %v1635_v52  ;;  %v539_v61 = vpop.permute.xlu1 %538  ;;  %v3794_v25 = vld [vmem:[#allocation24_spill] sm:$0xff] }
 0x116   : > { %v1641_v3 = vmul.f32 1.442695, %v1559_v24  ;;  %v2000_v38 = vpop.eup %1999  ;;  %v1773_v27 = vadd.f32 %v1994_v28, %v1772_v16  ;;  %2011 = vpow2.f32 %v1637_v21  ;;  %vm1035_vm14 = vcmp.eq.f32.partialorder %v3054_v6, inf  ;;  %v1405_v28 = vpop.permute.xlu0 %1404 }
 0x117   : > { %v1643_v5 = vmul.f32 1.442695, %v1560_v4  ;;  %v2002_v41 = vpop.eup %2001  ;;  %v1737_v20 = vadd.f32 %v2000_v38, %v1736_v9  ;;  %2013 = vpow2.f32 %v1639_v31  ;;  %v1563_v18 = vmul.f32 -20.0, %v1499_v23 }
 0x118   : > { %v1036_v35 = vsel %vm1035_vm14, %v3054_v6, %v1034_v53  ;;  %vm1084_vm15 = vcmp.eq.f32.partialorder %v2543_v26, inf  ;;  %v1774_v54 = vadd.f32 %v2002_v41, %v1773_v27  ;;  %v1564_v22 = vmul.f32 -20.0, %v1500_v58 }
 0x119   : > { %2015 = vpow2.f32 %v1641_v3  ;;  %v1038_v2 = vand.u32 2147483648, %v3054_v6  ;;  %v745_v32 = vmul.f32 %v617_v15, %v617_v15  ;;  %v746_v49 = vmul.f32 %v618_v37, %v618_v37  ;;  %v543_v53 = vpop.permute.xlu1 %542 }
 0x11a   : > { %2017 = vpow2.f32 %v1643_v5  ;;  %vm1037_vm0 = vcmp.eq.f32.partialorder %v3054_v6, 0.0  ;;  %v2004_v51 = vpop.eup %2003  ;;  %v438_v29 = vsub.f32 %v2422_v59, %v3046_v19  ;;  %v439_v12 = vsub.f32 %v2430_v1, %v3046_v19  ;;  %v547_v4 = vpop.permute.xlu0 %546 }
 0x11b   : > { %v1039_v46 = vsel %vm1037_vm0, %v1038_v2, %v1036_v35  ;;  %2019 = vrsqrt.f32 %v3057_v34  ;;  %vm1086_vm1 = vcmp.eq.f32.partialorder %v2543_v26, 0.0  ;;  %v2006_v52 = vpop.eup %2005  ;;  %v1738_v15 = vadd.f32 %v2004_v51, %v1737_v20 }
 0x11c   : > { %v1649_v37 = vmul.f32 1.442695, %v1563_v18  ;;  %v1505_v45 = vadd.f32 %v3147_v39, %v1039_v46  ;;  %2021 = vrsqrt.f32 %v2980_v14  ;;  %v1775_v6 = vadd.f32 %v2006_v52, %v1774_v54 }
 0x11d   : > { %v1651_v50 = vmul.f32 1.442695, %v1564_v22  ;;  %2023 = vrsqrt.f32 %v2983_v47  ;;  %v1083_v59 = vmul.f32 %v2899_v17, %v2543_v26  ;;  %v3169_v1 = vadd.f32 %v3074_v33, %v2936_v13  ;;  %v3795_v13 = vld [vmem:[#allocation21_spill] sm:$0xff] }
 0x11e   : > { %v3173_v19 = vadd.f32 %v3128_v11, %v2938_v43  ;;  %v3177_v21 = vmul.f32 %v3066_v60, %v3066_v60  ;;  %v3179_v23 = vmul.f32 %v434_v56, %v434_v56  ;;  %v2008_v7 = vpop.eup %2007  ;;  %v3182_v48 = vadd.f32 %v745_v32, %v2958_v42 }
 0x11f   : > { %v3185_v17 = vadd.f32 %v746_v49, %v3794_v25  ;;  %v3187_v31 = vmul.f32 %v435_v0, %v435_v0  ;;  %v1511_v33 = vadd.f32 %v1405_v28, %v3795_v13  ;;  %v2010_v24 = vpop.eup %2009  ;;  %v3190_v43 = vmul.f32 %v438_v29, %v438_v29  ;;  %v3797_v13 = vld [vmem:[#allocation3_spill] sm:$0xff] }
 0x120   : > { %v1739_v11 = vadd.f32 %v2008_v7, %v1738_v15  ;;  %2025 = vpow2.f32 %v1649_v37  ;;  %v1569_v60 = vmul.f32 -20.0, %v1505_v45  ;;  %v2012_v56 = vpop.eup %2011  ;;  %v3192_v16 = vmul.f32 %v439_v12, %v439_v12  ;;  %v3217_v15 = vpop.permute.xlu1 %1379 }
 0x121   : > { %v1776_v58 = vadd.f32 %v2010_v24, %v1775_v6  ;;  %2027 = vpow2.f32 %v1651_v50  ;;  %v1085_v42 = vsel %vm1084_vm15, %v2543_v26, %v1083_v59  ;;  %v2014_v0 = vpop.eup %2013  ;;  %vm1042_vm2 = vcmp.eq.f32.partialorder %v3057_v34, inf }
 0x122   : > { %v1740_v9 = vadd.f32 %v2012_v56, %v1739_v11  ;;  %v1045_v3 = vand.u32 2147483648, %v3057_v34  ;;  %v623_v38 = vsub.f32 %v2418_v57, %v539_v61  ;;  %v624_v27 = vsub.f32 %v2425_v62, %v539_v61 }
 0x123   : > { %v2016_v5 = vpop.eup %2015  ;;  %v1777_v41 = vadd.f32 %v2014_v0, %v1776_v58  ;;  %vm979_vm3 = vcmp.eq.f32.partialorder %v2980_v14, inf  ;;  %vm981_vm4 = vcmp.eq.f32.partialorder %v2980_v14, 0.0  ;;  %v1575_v20 = vmul.f32 -20.0, %v1511_v33  ;;  %v3798_v33 = vld [vmem:[#allocation4_spill] sm:$0xff] }
 0x124   : > { %v2018_v18 = vpop.eup %2017  ;;  %v3203_v35 = vadd.f32 %v2016_v5, %v1740_v9  ;;  %v1661_v54 = vmul.f32 1.442695, %v1569_v60  ;;  %v3796_v22 = vand.u32 2147483648, %v2543_v26  ;;  %v627_v32 = vsub.f32 %v2418_v57, %v547_v4  ;;  %v3800_v9 = vld [vmem:[#allocation10_spill] sm:$0xff] }
 0x125   : > { %v2020_v49 = vpop.eup %2019  ;;  %v3210_v61 = vadd.f32 %v2018_v18, %v1777_v41  ;;  %vm1044_vm5 = vcmp.eq.f32.partialorder %v3057_v34, 0.0  ;;  %v982_v51 = vand.u32 2147483648, %v2980_v14  ;;  %vm986_vm6 = vcmp.eq.f32.partialorder %v2983_v47, inf  ;;  %v559_v41 = vpop.permute.xlu0 %558 }
 0x126   : > { %v1088_v2 = vsel %vm1086_vm1, %v3796_v22, %v1085_v42  ;;  %v2022_v12 = vpop.eup %2021  ;;  %vm988_vm7 = vcmp.eq.f32.partialorder %v2983_v47, 0.0  ;;  %v989_v46 = vand.u32 2147483648, %v2983_v47  ;;  %v751_v52 = vmul.f32 %v623_v38, %v623_v38  ;;  %v1385_v22 = vpop.permute.xlu1 %1384 }
 0x127   : > { %v1512_v29 = vadd.f32 %v1405_v28, %v1088_v2  ;;  %v752_v26 = vmul.f32 %v624_v27, %v624_v27  ;;  %v2024_v37 = vpop.eup %2023  ;;  %v1041_v45 = vmul.f32 %v2020_v49, %v3057_v34  ;;  %v978_v6 = vmul.f32 %v2022_v12, %v2980_v14  ;;  %v3801_v49 = vld [vmem:[#allocation11_spill] sm:$0xff] }
 0x128   : > { %v1673_v50 = vmul.f32 1.442695, %v1575_v20  ;;  %v628_v59 = vsub.f32 %v2425_v62, %v547_v4  ;;  %2029 = vpow2.f32 %v1661_v54  ;;  %v985_v28 = vmul.f32 %v2024_v37, %v2983_v47  ;;  %v3799_v4 = vld [vmem:[#allocation9_spill] sm:$0xff] }
 0x129   : > { %v755_v7 = vmul.f32 %v627_v32, %v627_v32  ;;  %v625_v25 = vsub.f32 %v2418_v57, %v543_v53  ;;  %vm1021_vm8 = vcmp.eq.f32.partialorder %v3797_v13, inf  ;;  %vm1028_vm9 = vcmp.eq.f32.partialorder %v3798_v33, inf }
 0x12a   : > { %v980_v24 = vsel %vm979_vm3, %v2980_v14, %v978_v6  ;;  %v1576_v11 = vmul.f32 -20.0, %v1512_v29  ;;  %v626_v60 = vsub.f32 %v2425_v62, %v543_v53  ;;  %2031 = vrsqrt.f32 %v3024_v63  ;;  %v3232_v56 = vpop.eup %2025 }
 0x12b   : > { %vm1023_vm10 = vcmp.eq.f32.partialorder %v3797_v13, 0.0  ;;  %v983_v58 = vsel %vm981_vm4, %v982_v51, %v980_v24  ;;  %v987_v42 = vsel %vm986_vm6, %v2983_v47, %v985_v28  ;;  %v3240_v0 = vadd.f32 %v751_v52, %v3799_v4  ;;  %v3246_v53 = vpop.eup %2027  ;;  %v551_v4 = vpop.permute.xlu1 %550 }
 0x12c   : > { %v3243_v38 = vadd.f32 %v752_v26, %v3800_v9  ;;  %vm1030_vm11 = vcmp.eq.f32.partialorder %v3798_v33, 0.0  ;;  %v1043_v27 = vsel %vm1042_vm2, %v3057_v34, %v1041_v45  ;;  %v990_v14 = vsel %vm988_vm7, %v989_v46, %v987_v42  ;;  %v3802_v26 = vld [vmem:[#allocation22_spill] sm:$0xff]  ;;  %v3803_v45 = vld [vmem:[#allocation23_spill] sm:$0xff] }
 0x12d   : > { %v1497_v5 = vadd.f32 %v3144_v55, %v983_v58  ;;  %2033 = vpow2.f32 %v1673_v50  ;;  %v1498_v20 = vadd.f32 %v3144_v55, %v990_v14  ;;  %v756_v18 = vmul.f32 %v628_v59, %v628_v59  ;;  %v3804_v50 = vld [vmem:[#allocation26_spill] sm:$0xff] }
 0x12e   : > { %v753_v54 = vmul.f32 %v625_v25, %v625_v25  ;;  %2035 = vrsqrt.f32 %v3027_v40  ;;  %v3256_v32 = vmul.f32 1.442695, %v1576_v11  ;;  %v3259_v51 = vadd.f32 %v755_v7, %v3801_v49  ;;  %v3805_v7 = vld [vmem:[#allocation12_spill] sm:$0xff] }
 0x12f   : > { %v1561_v2 = vmul.f32 -20.0, %v1497_v5  ;;  %v754_v29 = vmul.f32 %v626_v60, %v626_v60  ;;  %v1046_v47 = vsel %vm1044_vm5, %v1045_v3, %v1043_v27  ;;  %v1562_v12 = vmul.f32 -20.0, %v1498_v20 }
 0x130   : > { %v633_v55 = vsub.f32 %v2418_v57, %v559_v41  ;;  %v634_v46 = vsub.f32 %v2425_v62, %v559_v41  ;;  %v1020_v37 = vmul.f32 %v3802_v26, %v3797_v13  ;;  %v1027_v6 = vmul.f32 %v3803_v45, %v3798_v33 }
 0x131   : > { %v1645_v52 = vmul.f32 1.442695, %v1561_v2  ;;  %2037 = vrsqrt.f32 %v3804_v50  ;;  %v1506_v59 = vadd.f32 %v3147_v39, %v1046_v47  ;;  %v1647_v28 = vmul.f32 1.442695, %v1562_v12 }
 0x132   : > { %v3274_v34 = vadd.f32 %v756_v18, %v3805_v7  ;;  %v3277_v3 = vadd.f32 %v753_v54, %v3019_v36  ;;  %vm1007_vm12 = vcmp.eq.f32.partialorder %v3024_v63, inf  ;;  %v1022_v25 = vsel %vm1021_vm8, %v3797_v13, %v1020_v37  ;;  %v3286_v11 = vpop.eup %2029  ;;  %v571_v36 = vpop.permute.xlu0 %570  ;;  %v3808_v54 = vld [vmem:[#allocation27_spill] sm:$0xff] }
 0x133   : > { %2039 = vpow2.f32 %v1645_v52  ;;  %v1029_v24 = vsel %vm1028_vm9, %v3798_v33, %v1027_v6  ;;  %v3289_v39 = vadd.f32 %v754_v29, %v3021_v10  ;;  %v3291_v60 = vmul.f32 %v633_v55, %v633_v55 }
 0x134   : > { %2041 = vpow2.f32 %v1647_v28  ;;  %v3806_v58 = vand.u32 2147483648, %v3797_v13  ;;  %v2032_v9 = vpop.eup %2031  ;;  %v3297_v27 = vmul.f32 %v634_v46, %v634_v46  ;;  %vm1009_vm13 = vcmp.eq.f32.partialorder %v3024_v63, 0.0 }
 0x135   : > { %v3807_v14 = vand.u32 2147483648, %v3798_v33  ;;  %v1570_v41 = vmul.f32 -20.0, %v1506_v59  ;;  %v1006_v20 = vmul.f32 %v2032_v9, %v3024_v63  ;;  %2043 = vrsqrt.f32 %v3808_v54  ;;  %v3323_v59 = vpop.permute.xlu1 %554 }
 0x136   : > { %v1025_v42 = vsel %vm1023_vm10, %v3806_v58, %v1022_v25  ;;  %v1010_v2 = vand.u32 2147483648, %v3024_v63  ;;  %v639_v49 = vsub.f32 %v2418_v57, %v571_v36  ;;  %v629_v47 = vsub.f32 %v2418_v57, %v551_v4 }
 0x137   : > { %v1032_v10 = vsel %vm1030_vm11, %v3807_v14, %v1029_v24  ;;  %v1503_v5 = vadd.f32 %v1385_v22, %v1025_v42  ;;  %v3306_v13 = vpop.eup %2033  ;;  %v1008_v33 = vsel %vm1007_vm12, %v3024_v63, %v1006_v20  ;;  %vm1014_vm14 = vcmp.eq.f32.partialorder %v3027_v40, inf }
 0x138   : > { %v1504_v18 = vadd.f32 %v1385_v22, %v1032_v10  ;;  %v2036_v12 = vpop.eup %2035  ;;  %vm1016_vm15 = vcmp.eq.f32.partialorder %v3027_v40, 0.0  ;;  %2045 = vrsqrt.f32 %v3277_v3  ;;  %v1011_v22 = vsel %vm1009_vm13, %v1010_v2, %v1008_v33 }
 0x139   : > { %v1567_v29 = vmul.f32 -20.0, %v1503_v5  ;;  %v1013_v55 = vmul.f32 %v2036_v12, %v3027_v40  ;;  %v1017_v46 = vand.u32 2147483648, %v3027_v40  ;;  %v1663_v26 = vmul.f32 1.442695, %v1570_v41 }
 0x13a   : > { %v1568_v52 = vmul.f32 -20.0, %v1504_v18  ;;  %v1501_v37 = vadd.f32 %v3217_v15, %v1011_v22  ;;  %v630_v45 = vsub.f32 %v2425_v62, %v551_v4  ;;  %v757_v6 = vmul.f32 %v629_v47, %v629_v47 }
 0x13b   : > { %v2038_v28 = vpop.eup %2037  ;;  %v1015_v7 = vsel %vm1014_vm14, %v3027_v40, %v1013_v55  ;;  %v640_v25 = vsub.f32 %v2425_v62, %v571_v36  ;;  %v767_v63 = vmul.f32 %v639_v49, %v639_v49  ;;  %v1657_v24 = vmul.f32 1.442695, %v1567_v29 }
 0x13c   : > { %v1018_v58 = vsel %vm1016_vm15, %v1017_v46, %v1015_v7  ;;  %v1565_v42 = vmul.f32 -20.0, %v1501_v37  ;;  %v1118_v9 = vmul.f32 %v2038_v28, %v3804_v50  ;;  %vm1119_vm0 = vcmp.eq.f32.partialorder %v3804_v50, inf }
 0x13d   : > { %v2040_v14 = vpop.eup %2039  ;;  %v1502_v4 = vadd.f32 %v3217_v15, %v1018_v58  ;;  %v1659_v10 = vmul.f32 1.442695, %v1568_v52  ;;  %vm1121_vm1 = vcmp.eq.f32.partialorder %v3804_v50, 0.0  ;;  %2047 = vrsqrt.f32 %v3289_v39 }
 0x13e   : > { %v2042_v5 = vpop.eup %2041  ;;  %v1742_v36 = vadd.f32 %v2040_v14, %v3203_v35  ;;  %v1653_v41 = vmul.f32 1.442695, %v1565_v42  ;;  %v758_v20 = vmul.f32 %v630_v45, %v630_v45  ;;  %v3336_v40 = vadd.f32 %v757_v6, %v3037_v30  ;;  %v3345_v35 = vpop.permute.xlu1 %1394 }
 0x13f   : > { %v1779_v18 = vadd.f32 %v2042_v5, %v3210_v61  ;;  %v1566_v2 = vmul.f32 -20.0, %v1502_v4  ;;  %2049 = vpow2.f32 %v1657_v24  ;;  %v1122_v49 = vand.u32 2147483648, %v3804_v50  ;;  %v2044_v15 = vpop.eup %2043  ;;  %v1420_v61 = vpop.permute.xlu0 %1419 }
 0x140   : > { %2051 = vpow2.f32 %v1653_v41  ;;  %v1743_v29 = vadd.f32 %v3232_v56, %v1742_v36  ;;  %v1120_v47 = vsel %vm1119_vm0, %v3804_v50, %v1118_v9  ;;  %vm1126_vm2 = vcmp.eq.f32.partialorder %v3808_v54, inf }
 0x141   : > { %v1655_v30 = vmul.f32 1.442695, %v1566_v2  ;;  %v1780_v12 = vadd.f32 %v3246_v53, %v1779_v18  ;;  %2053 = vpow2.f32 %v1659_v10  ;;  %v1125_v33 = vmul.f32 %v2044_v15, %v3808_v54 }
 0x142   : > { %v2046_v22 = vpop.eup %2045  ;;  %vm1128_vm3 = vcmp.eq.f32.partialorder %v3808_v54, 0.0  ;;  %v1129_v56 = vand.u32 2147483648, %v3808_v54  ;;  %v3352_v55 = vadd.f32 %v758_v20, %v3044_v8  ;;  %2055 = vrsqrt.f32 %v3336_v40  ;;  %v3372_v24 = vpop.permute.xlu1 %1399  ;;  %v3812_v20 = vld [vmem:[#allocation6_spill] sm:$0xff] }
 0x143   : > { %2057 = vpow2.f32 %v1655_v30  ;;  %v1123_v46 = vsel %vm1121_vm1, %v1122_v49, %v1120_v47  ;;  %v1127_v53 = vsel %vm1126_vm2, %v3808_v54, %v1125_v33  ;;  %v1146_v52 = vmul.f32 %v2046_v22, %v3277_v3 }
 0x144   : > { %v1130_v37 = vsel %vm1128_vm3, %v1129_v56, %v1127_v53  ;;  %v1517_v45 = vadd.f32 %v1420_v61, %v1123_v46  ;;  %vm1147_vm4 = vcmp.eq.f32.partialorder %v3277_v3, inf  ;;  %v1150_v6 = vand.u32 2147483648, %v3277_v3 }
 0x145   : > { %2059 = vpow2.f32 %v3256_v32  ;;  %v1518_v8 = vadd.f32 %v1420_v61, %v1130_v37  ;;  %v1148_v28 = vsel %vm1147_vm4, %v3277_v3, %v1146_v52  ;;  %vm1149_vm5 = vcmp.eq.f32.partialorder %v3277_v3, 0.0  ;;  %v3809_v32 = vld [vmem:[#allocation17_spill] sm:$0xff] }
 0x146   : > { %2061 = vpow2.f32 %v1663_v26  ;;  %v3366_v50 = vadd.f32 %v3291_v60, %v3132_v44  ;;  %v3370_v54 = vadd.f32 %v3297_v27, %v3177_v21  ;;  %v1151_v7 = vsel %vm1149_vm5, %v1150_v6, %v1148_v28  ;;  %v1430_v26 = vpop.permute.xlu0 %1429  ;;  %v3810_v21 = vld [vmem:[#allocation5_spill] sm:$0xff]  ;;  %v3394_v22 = vpop.permute.xlu1 %562 }
 0x147   : > { %v2048_v58 = vpop.eup %2047  ;;  %v768_v42 = vmul.f32 %v640_v25, %v640_v25  ;;  %v3375_v9 = vadd.f32 %v767_v63, %v3809_v32  ;;  %vm1154_vm6 = vcmp.eq.f32.partialorder %v3289_v39, inf  ;;  %2063 = vrsqrt.f32 %v3352_v55  ;;  %v3811_v60 = vld [vmem:[#allocation25_spill] sm:$0xff] }
 0x148   : > { %v1581_v3 = vmul.f32 -20.0, %v1517_v45  ;;  %v1153_v44 = vmul.f32 %v2048_v58, %v3289_v39  ;;  %vm1156_vm7 = vcmp.eq.f32.partialorder %v3289_v39, 0.0  ;;  %v1048_v27 = vmul.f32 %v3811_v60, %v3810_v21 }
 0x149   : > { %v2050_v14 = vpop.eup %2049  ;;  %v1582_v4 = vmul.f32 -20.0, %v1518_v8  ;;  %v1157_v25 = vand.u32 2147483648, %v3289_v39  ;;  %v1521_v10 = vadd.f32 %v1430_v26, %v1151_v7  ;;  %vm1049_vm8 = vcmp.eq.f32.partialorder %v3810_v21, inf  ;;  %v3813_v8 = vld [vmem:[#allocation18_spill] sm:$0xff] }
 0x14a   : > { %v2052_v63 = vpop.eup %2051  ;;  %v1155_v5 = vsel %vm1154_vm6, %v3289_v39, %v1153_v44  ;;  %v1050_v36 = vsel %vm1049_vm8, %v3810_v21, %v1048_v27  ;;  %v1052_v41 = vand.u32 2147483648, %v3810_v21  ;;  %2065 = vrsqrt.f32 %v3812_v20 }
 0x14b   : > { %v2054_v18 = vpop.eup %2053  ;;  %v1744_v2 = vadd.f32 %v2052_v63, %v1743_v29  ;;  %v1158_v49 = vsel %vm1156_vm7, %v1157_v25, %v1155_v5  ;;  %v631_v15 = vsub.f32 %v2418_v57, %v3323_v59  ;;  %vm1051_vm9 = vcmp.eq.f32.partialorder %v3810_v21, 0.0  ;;  %v1440_v5 = vpop.permute.xlu0 %1439 }
 0x14c   : > { %v2056_v47 = vpop.eup %2055  ;;  %v1685_v30 = vmul.f32 1.442695, %v1581_v3  ;;  %v1522_v61 = vadd.f32 %v1430_v26, %v1158_v49  ;;  %v632_v39 = vsub.f32 %v2425_v62, %v3323_v59  ;;  %v1053_v33 = vsel %vm1051_vm9, %v1052_v41, %v1050_v36 }
 0x14d   : > { %v2058_v56 = vpop.eup %2057  ;;  %v1745_v46 = vadd.f32 %v2050_v14, %v1744_v2  ;;  %v1174_v53 = vmul.f32 %v2056_v47, %v3336_v40  ;;  %vm1175_vm10 = vcmp.eq.f32.partialorder %v3336_v40, inf  ;;  %v1507_v29 = vadd.f32 %v3345_v35, %v1053_v33 }
 0x14e   : > { %v1781_v52 = vadd.f32 %v2058_v56, %v1780_v12  ;;  %v1687_v37 = vmul.f32 1.442695, %v1582_v4  ;;  %v1585_v45 = vmul.f32 -20.0, %v1521_v10  ;;  %2067 = vrsqrt.f32 %v3366_v50  ;;  %v567_v4 = vpop.permute.xlu1 %566 }
 0x14f   : > { %v3400_v6 = vpop.eup %2059  ;;  %v3403_v59 = vadd.f32 %v768_v42, %v3813_v8  ;;  %v3405_v28 = vmul.f32 %v631_v15, %v631_v15  ;;  %v1176_v7 = vsel %vm1175_vm10, %v3336_v40, %v1174_v53  ;;  %v1571_v58 = vmul.f32 -20.0, %v1507_v29 }
 0x150   : > { %v2062_v32 = vpop.eup %2061  ;;  %v1782_v3 = vadd.f32 %v2054_v18, %v1781_v52  ;;  %2069 = vpow2.f32 %v1685_v30  ;;  %v1586_v26 = vmul.f32 -20.0, %v1522_v61  ;;  %v1178_v12 = vand.u32 2147483648, %v3336_v40 }
 0x151   : > { %v2064_v44 = vpop.eup %2063  ;;  %v3409_v21 = vmul.f32 %v632_v39, %v632_v39  ;;  %vm1177_vm11 = vcmp.eq.f32.partialorder %v3336_v40, 0.0  ;;  %v1665_v60 = vmul.f32 1.442695, %v1571_v58  ;;  %2071 = vrsqrt.f32 %v3370_v54 }
 0x152   : > { %2073 = vpow2.f32 %v1687_v37  ;;  %v1693_v42 = vmul.f32 1.442695, %v1585_v45  ;;  %v1179_v27 = vsel %vm1177_vm11, %v1178_v12, %v1176_v7  ;;  %v1181_v14 = vmul.f32 %v2064_v44, %v3352_v55  ;;  %v3430_v39 = vpop.permute.xlu1 %1409  ;;  %v1450_v7 = vpop.permute.xlu0 %1449 }
 0x153   : > { %vm1182_vm12 = vcmp.eq.f32.partialorder %v3352_v55, inf  ;;  %vm1184_vm13 = vcmp.eq.f32.partialorder %v3352_v55, 0.0  ;;  %v1185_v25 = vand.u32 2147483648, %v3352_v55  ;;  %2075 = vpow2.f32 %v1665_v60 }
 0x154   : > { %v2066_v10 = vpop.eup %2065  ;;  %v1695_v63 = vmul.f32 1.442695, %v1586_v26  ;;  %v1183_v40 = vsel %vm1182_vm12, %v3352_v55, %v1181_v14  ;;  %vm1056_vm14 = vcmp.eq.f32.partialorder %v3812_v20, inf  ;;  %2077 = vrsqrt.f32 %v3169_v1 }
 0x155   : > { %v1186_v36 = vsel %vm1184_vm13, %v1185_v25, %v1183_v40  ;;  %v1525_v41 = vadd.f32 %v1440_v5, %v1179_v27  ;;  %v1055_v18 = vmul.f32 %v2066_v10, %v3812_v20  ;;  %2079 = vrsqrt.f32 %v3173_v19 }
 0x156   : > { %2081 = vpow2.f32 %v1693_v42  ;;  %v1526_v2 = vadd.f32 %v1440_v5, %v1186_v36  ;;  %vm1058_vm15 = vcmp.eq.f32.partialorder %v3812_v20, 0.0  ;;  %v1059_v49 = vand.u32 2147483648, %v3812_v20  ;;  %v3460_v25 = vpop.permute.xlu1 %1414 }
 0x157   : > { %v1057_v15 = vsel %vm1056_vm14, %v3812_v20, %v1055_v18  ;;  %v1746_v55 = vadd.f32 %v3286_v11, %v1745_v46  ;;  %vm1203_vm0 = vcmp.eq.f32.partialorder %v3366_v50, inf  ;;  %vm1205_vm1 = vcmp.eq.f32.partialorder %v3366_v50, 0.0 }
 0x158   : > { %v2068_v47 = vpop.eup %2067  ;;  %2083 = vpow2.f32 %v1695_v63  ;;  %v1060_v30 = vsel %vm1058_vm15, %v1059_v49, %v1057_v15  ;;  %v1206_v61 = vand.u32 2147483648, %v3366_v50  ;;  %vm1210_vm2 = vcmp.eq.f32.partialorder %v3370_v54, inf }
 0x159   : > { %v1589_v33 = vmul.f32 -20.0, %v1525_v41  ;;  %v1508_v56 = vadd.f32 %v3345_v35, %v1060_v30  ;;  %v3433_v53 = vadd.f32 %v2062_v32, %v1782_v3  ;;  %v1202_v11 = vmul.f32 %v2068_v47, %v3366_v50 }
 0x15a   : > { %v3436_v20 = vpop.eup %2069  ;;  %v1590_v46 = vmul.f32 -20.0, %v1526_v2  ;;  %vm1212_vm3 = vcmp.eq.f32.partialorder %v3370_v54, 0.0  ;;  %v1213_v29 = vand.u32 2147483648, %v3370_v54  ;;  %2085 = vrsqrt.f32 %v3182_v48 }
 0x15b   : > { %v2072_v52 = vpop.eup %2071  ;;  %v1572_v37 = vmul.f32 -20.0, %v1508_v56  ;;  %v1204_v45 = vsel %vm1203_vm0, %v3366_v50, %v1202_v11  ;;  %vm1063_vm4 = vcmp.eq.f32.partialorder %v3169_v1, inf  ;;  %v637_v35 = vsub.f32 %v2418_v57, %v567_v4 }
 0x15c   : > { %v3446_v8 = vpop.eup %2073  ;;  %v1207_v58 = vsel %vm1205_vm1, %v1206_v61, %v1204_v45  ;;  %v1209_v32 = vmul.f32 %v2072_v52, %v3370_v54  ;;  %vm1065_vm5 = vcmp.eq.f32.partialorder %v3169_v1, 0.0  ;;  %v638_v3 = vsub.f32 %v2425_v62, %v567_v4 }
 0x15d   : > { %v2076_v26 = vpop.eup %2075  ;;  %v1701_v12 = vmul.f32 1.442695, %v1589_v33  ;;  %v1667_v44 = vmul.f32 1.442695, %v1572_v37  ;;  %v1066_v60 = vand.u32 2147483648, %v3169_v1  ;;  %vm1070_vm6 = vcmp.eq.f32.partialorder %v3173_v19, inf }
 0x15e   : > { %v2078_v42 = vpop.eup %2077  ;;  %v1703_v27 = vmul.f32 1.442695, %v1590_v46  ;;  %v3455_v14 = vadd.f32 %v2076_v26, %v1746_v55  ;;  %vm1072_vm7 = vcmp.eq.f32.partialorder %v3173_v19, 0.0  ;;  %v635_v50 = vsub.f32 %v2418_v57, %v3394_v22  ;;  %v3814_v33 = vld [vmem:[#allocation7_spill] sm:$0xff] }
 0x15f   : > { %v2080_v10 = vpop.eup %2079  ;;  %2087 = vpow2.f32 %v1667_v44  ;;  %v1529_v4 = vadd.f32 %v1450_v7, %v1207_v58  ;;  %v1062_v63 = vmul.f32 %v2078_v42, %v3169_v1  ;;  %v765_v5 = vmul.f32 %v637_v35, %v637_v35  ;;  %v575_v35 = vpop.permute.xlu1 %574 }
 0x160   : > { %v3463_v40 = vpop.eup %2081  ;;  %v1211_v36 = vsel %vm1210_vm2, %v3370_v54, %v1209_v32  ;;  %v1069_v41 = vmul.f32 %v2080_v10, %v3173_v19  ;;  %v766_v18 = vmul.f32 %v638_v3, %v638_v3  ;;  %2089 = vrsqrt.f32 %v3185_v17 }
 0x161   : > { %2091 = vpow2.f32 %v1701_v12  ;;  %v1064_v2 = vsel %vm1063_vm4, %v3169_v1, %v1062_v63  ;;  %v1073_v49 = vand.u32 2147483648, %v3173_v19  ;;  %v636_v15 = vsub.f32 %v2425_v62, %v3394_v22 }
 0x162   : > { %v3476_v55 = vpop.eup %2083  ;;  %v1067_v47 = vsel %vm1065_vm5, %v1066_v60, %v1064_v2  ;;  %v1071_v30 = vsel %vm1070_vm6, %v3173_v19, %v1069_v41  ;;  %v3483_v61 = vmul.f32 %v635_v50, %v635_v50  ;;  %2093 = vrsqrt.f32 %v3814_v33  ;;  %v3815_v19 = vld [vmem:[#allocation8_spill] sm:$0xff] }
 0x163   : > { %v1214_v56 = vsel %vm1212_vm3, %v1213_v29, %v1211_v36  ;;  %v1593_v11 = vmul.f32 -20.0, %v1529_v4  ;;  %v1074_v22 = vsel %vm1072_vm7, %v1073_v49, %v1071_v30  ;;  %v1509_v46 = vadd.f32 %v3372_v24, %v1067_v47 }
 0x164   : > { %v2086_v52 = vpop.eup %2085  ;;  %2095 = vpow2.f32 %v1703_v27  ;;  %v1510_v1 = vadd.f32 %v3372_v24, %v1074_v22  ;;  %v3493_v37 = vadd.f32 %v765_v5, %v3179_v23  ;;  %v3496_v45 = vadd.f32 %v766_v18, %v3187_v31 }
 0x165   : > { %v1573_v58 = vmul.f32 -20.0, %v1509_v46  ;;  %v1090_v54 = vmul.f32 %v2086_v52, %v3182_v48  ;;  %vm1091_vm8 = vcmp.eq.f32.partialorder %v3182_v48, inf  ;;  %2097 = vrsqrt.f32 %v3815_v19  ;;  %v579_v52 = vpop.permute.xlu1 %578 }
 0x166   : > { %v1530_v29 = vadd.f32 %v1450_v7, %v1214_v56  ;;  %v1574_v32 = vmul.f32 -20.0, %v1510_v1  ;;  %vm1093_vm9 = vcmp.eq.f32.partialorder %v3182_v48, 0.0  ;;  %v1094_v24 = vand.u32 2147483648, %v3182_v48 }
 0x167   : > { %v1709_v3 = vmul.f32 1.442695, %v1593_v11  ;;  %v1669_v23 = vmul.f32 1.442695, %v1573_v58  ;;  %v1092_v26 = vsel %vm1091_vm8, %v3182_v48, %v1090_v54  ;;  %v641_v31 = vsub.f32 %v2418_v57, %v575_v35 }
 0x168   : > { %v1671_v12 = vmul.f32 1.442695, %v1574_v32  ;;  %v1095_v44 = vsel %vm1093_vm9, %v1094_v24, %v1092_v26  ;;  %v642_v60 = vsub.f32 %v2425_v62, %v575_v35  ;;  %2099 = vrsqrt.f32 %v3493_v37 }
 0x169   : > { %v2088_v42 = vpop.eup %2087  ;;  %2101 = vpow2.f32 %v1669_v23  ;;  %v3507_v7 = vmul.f32 %v636_v15, %v636_v15  ;;  %v1513_v27 = vadd.f32 %v3430_v39, %v1095_v44  ;;  %v769_v50 = vmul.f32 %v641_v31, %v641_v31 }
 0x16a   : > { %v2090_v10 = vpop.eup %2089  ;;  %v1784_v4 = vadd.f32 %v2088_v42, %v3433_v53  ;;  %2103 = vpow2.f32 %v1671_v12  ;;  %vm1098_vm10 = vcmp.eq.f32.partialorder %v3185_v17, inf  ;;  %vm1100_vm11 = vcmp.eq.f32.partialorder %v3185_v17, 0.0 }
 0x16b   : > { %v3513_v48 = vpop.eup %2091  ;;  %2105 = vpow2.f32 %v1709_v3  ;;  %v1097_v63 = vmul.f32 %v2090_v10, %v3185_v17  ;;  %v1577_v5 = vmul.f32 -20.0, %v1513_v27  ;;  %v3517_v36 = vadd.f32 %v769_v50, %v3190_v43 }
 0x16c   : > { %v2094_v41 = vpop.eup %2093  ;;  %v1594_v18 = vmul.f32 -20.0, %v1530_v29  ;;  %v1101_v2 = vand.u32 2147483648, %v3185_v17  ;;  %v770_v49 = vmul.f32 %v642_v60, %v642_v60  ;;  %2107 = vrsqrt.f32 %v3496_v45 }
 0x16d   : > { %v1099_v53 = vsel %vm1098_vm10, %v3185_v17, %v1097_v63  ;;  %v1104_v15 = vmul.f32 %v2094_v41, %v3814_v33  ;;  %vm1105_vm12 = vcmp.eq.f32.partialorder %v3814_v33, inf  ;;  %vm1107_vm13 = vcmp.eq.f32.partialorder %v3814_v33, 0.0 }
 0x16e   : > { %v3525_v47 = vpop.eup %2095  ;;  %v1102_v43 = vsel %vm1100_vm11, %v1101_v2, %v1099_v53  ;;  %v1677_v30 = vmul.f32 1.442695, %v1577_v5  ;;  %v1108_v56 = vand.u32 2147483648, %v3814_v33  ;;  %2109 = vrsqrt.f32 %v3517_v36 }
 0x16f   : > { %v2098_v11 = vpop.eup %2097  ;;  %v1514_v22 = vadd.f32 %v3430_v39, %v1102_v43  ;;  %v1106_v46 = vsel %vm1105_vm12, %v3814_v33, %v1104_v15  ;;  %vm1112_vm14 = vcmp.eq.f32.partialorder %v3815_v19, inf  ;;  %vm1114_vm15 = vcmp.eq.f32.partialorder %v3815_v19, 0.0 }
 0x170   : > { %v1109_v1 = vsel %vm1107_vm13, %v1108_v56, %v1106_v46  ;;  %v1111_v35 = vmul.f32 %v2098_v11, %v3815_v19  ;;  %v1115_v17 = vand.u32 2147483648, %v3815_v19  ;;  %v3538_v58 = vadd.f32 %v770_v49, %v3192_v16  ;;  %v1460_v49 = vpop.permute.xlu0 %1459  ;;  %v3817_v56 = vld [vmem:[#allocation14_spill] sm:$0xff] }
 0x171   : > { %v1578_v54 = vmul.f32 -20.0, %v1514_v22  ;;  %v1515_v29 = vadd.f32 %v3460_v25, %v1109_v1  ;;  %vm1231_vm0 = vcmp.eq.f32.partialorder %v3493_v37, inf  ;;  %vm1233_vm1 = vcmp.eq.f32.partialorder %v3493_v37, 0.0  ;;  %v3818_v22 = vld [vmem:[#allocation15_spill] sm:$0xff] }
 0x172   : > { %v2100_v39 = vpop.eup %2099  ;;  %2111 = vpow2.f32 %v1677_v30  ;;  %v1113_v33 = vsel %vm1112_vm14, %v3815_v19, %v1111_v35  ;;  %v1234_v32 = vand.u32 2147483648, %v3493_v37  ;;  %v643_v24 = vsub.f32 %v2418_v57, %v579_v52  ;;  %v3819_v35 = vld [vmem:[#allocation16_spill] sm:$0xff] }
 0x173   : > { %v2102_v3 = vpop.eup %2101  ;;  %v1679_v23 = vmul.f32 1.442695, %v1578_v54  ;;  %v1116_v16 = vsel %vm1114_vm15, %v1115_v17, %v1113_v33  ;;  %v1579_v26 = vmul.f32 -20.0, %v1515_v29  ;;  %v1230_v31 = vmul.f32 %v2100_v39, %v3493_v37  ;;  %v3821_v33 = vld [vmem:[#allocation20_spill] sm:$0xff] }
 0x174   : > { %v2104_v12 = vpop.eup %2103  ;;  %v1748_v44 = vadd.f32 %v2102_v3, %v3455_v14  ;;  %v1516_v60 = vadd.f32 %v3460_v25, %v1116_v16  ;;  %v644_v42 = vsub.f32 %v2425_v62, %v579_v52  ;;  %2113 = vrsqrt.f32 %v3538_v58 }
 0x175   : > { %v3553_v27 = vpop.eup %2105  ;;  %v1785_v57 = vadd.f32 %v2104_v12, %v1784_v4  ;;  %2115 = vpow2.f32 %v1679_v23  ;;  %v1681_v50 = vmul.f32 1.442695, %v1579_v26  ;;  %v1232_v19 = vsel %vm1231_vm0, %v3493_v37, %v1230_v31  ;;  %v1425_v31 = vpop.permute.xlu1 %1424 }
 0x176   : > { %v2108_v10 = vpop.eup %2107  ;;  %v1749_v63 = vadd.f32 %v3306_v13, %v1748_v44  ;;  %v1580_v5 = vmul.f32 -20.0, %v1516_v60  ;;  %v1235_v14 = vsel %vm1233_vm1, %v1234_v32, %v1232_v19  ;;  %2117 = vrsqrt.f32 %v3240_v0  ;;  %v3613_v19 = vpop.permute.xlu0 %1469 }
 0x177   : > { %v1711_v62 = vmul.f32 1.442695, %v1594_v18  ;;  %v1786_v25 = vadd.f32 %v3400_v6, %v1785_v57  ;;  %2119 = vpow2.f32 %v1681_v50  ;;  %v1237_v4 = vmul.f32 %v2108_v10, %v3496_v45  ;;  %v3816_v18 = vld [vmem:[#allocation13_spill] sm:$0xff] }
 0x178   : > { %v2110_v41 = vpop.eup %2109  ;;  %v1683_v2 = vmul.f32 1.442695, %v1580_v5  ;;  %vm1238_vm2 = vcmp.eq.f32.partialorder %v3496_v45, inf  ;;  %v1241_v53 = vand.u32 2147483648, %v3496_v45  ;;  %v771_v13 = vmul.f32 %v643_v24, %v643_v24 }
 0x179   : > { %v1239_v15 = vsel %vm1238_vm2, %v3496_v45, %v1237_v4  ;;  %v1533_v37 = vadd.f32 %v1460_v49, %v1235_v14  ;;  %v1258_v43 = vmul.f32 %v2110_v41, %v3517_v36  ;;  %2121 = vrsqrt.f32 %v3243_v38 }
 0x17a   : > { %v3571_v6 = vadd.f32 %v3405_v28, %v3816_v18  ;;  %2123 = vpow2.f32 %v1683_v2  ;;  %vm1240_vm3 = vcmp.eq.f32.partialorder %v3496_v45, 0.0  ;;  %v772_v30 = vmul.f32 %v644_v42, %v644_v42 }
 0x17b   : > { %v3576_v11 = vadd.f32 %v3409_v21, %v3817_v56  ;;  %2125 = vpow2.f32 %v1711_v62  ;;  %v3580_v46 = vadd.f32 %v3483_v61, %v3818_v22  ;;  %v1242_v52 = vsel %vm1240_vm3, %v1241_v53, %v1239_v15  ;;  %v3820_v21 = vld [vmem:[#allocation19_spill] sm:$0xff] }
 0x17c   : > { %v2112_v1 = vpop.eup %2111  ;;  %v3584_v17 = vadd.f32 %v3507_v7, %v3819_v35  ;;  %vm1259_vm4 = vcmp.eq.f32.partialorder %v3517_v36, inf  ;;  %vm1261_vm5 = vcmp.eq.f32.partialorder %v3517_v36, 0.0  ;;  %2127 = vrsqrt.f32 %v3259_v51 }
 0x17d   : > { %v1597_v28 = vmul.f32 -20.0, %v1533_v37  ;;  %v3590_v45 = vadd.f32 %v771_v13, %v3820_v21  ;;  %v1260_v54 = vsel %vm1259_vm4, %v3517_v36, %v1258_v43  ;;  %v1262_v61 = vand.u32 2147483648, %v3517_v36  ;;  %v1435_v43 = vpop.permute.xlu1 %1434 }
 0x17e   : > { %v2114_v29 = vpop.eup %2113  ;;  %v1534_v39 = vadd.f32 %v1460_v49, %v1242_v52  ;;  %v3595_v32 = vadd.f32 %v772_v30, %v3821_v33  ;;  %vm1266_vm6 = vcmp.eq.f32.partialorder %v3538_v58, inf  ;;  %2129 = vrsqrt.f32 %v3274_v34 }
 0x17f   : > { %v2116_v7 = vpop.eup %2115  ;;  %vm1268_vm7 = vcmp.eq.f32.partialorder %v3538_v58, 0.0  ;;  %v1269_v24 = vand.u32 2147483648, %v3538_v58  ;;  %vm1133_vm8 = vcmp.eq.f32.partialorder %v3240_v0, inf  ;;  %vm1135_vm9 = vcmp.eq.f32.partialorder %v3240_v0, 0.0 }
 0x180   : > { %v1136_v3 = vand.u32 2147483648, %v3240_v0  ;;  %v2118_v23 = vpop.eup %2117  ;;  %v1750_v16 = vadd.f32 %v2112_v1, %v1749_v63  ;;  %v1263_v26 = vsel %vm1261_vm5, %v1262_v61, %v1260_v54  ;;  %vm1140_vm10 = vcmp.eq.f32.partialorder %v3243_v38, inf }
 0x181   : > { %2131 = vrsqrt.f32 %v3571_v6  ;;  %v2120_v12 = vpop.eup %2119  ;;  %v3608_v44 = vmul.f32 1.442695, %v1597_v28  ;;  %v1265_v60 = vmul.f32 %v2114_v29, %v3538_v58  ;;  %v1132_v42 = vmul.f32 %v2118_v23, %v3240_v0 }
 0x182   : > { %vm1142_vm11 = vcmp.eq.f32.partialorder %v3243_v38, 0.0  ;;  %v1751_v57 = vadd.f32 %v2120_v12, %v1750_v16  ;;  %v1598_v50 = vmul.f32 -20.0, %v1534_v39  ;;  %v1143_v36 = vand.u32 2147483648, %v3243_v38  ;;  %v1445_v16 = vpop.permute.xlu1 %1444 }
 0x183   : > { %vm1161_vm12 = vcmp.eq.f32.partialorder %v3259_v51, inf  ;;  %v2122_v10 = vpop.eup %2121  ;;  %v1787_v63 = vadd.f32 %v2116_v7, %v1786_v25  ;;  %v1537_v5 = vadd.f32 %v3613_v19, %v1263_v26  ;;  %v1134_v14 = vsel %vm1133_vm8, %v3240_v0, %v1132_v42 }
 0x184   : > { %vm1163_vm13 = vcmp.eq.f32.partialorder %v3259_v51, 0.0  ;;  %v2124_v62 = vpop.eup %2123  ;;  %v1137_v4 = vsel %vm1135_vm9, %v1136_v3, %v1134_v14  ;;  %v1139_v41 = vmul.f32 %v2122_v10, %v3243_v38  ;;  %v3626_v2 = vadd.f32 %v3436_v20, %v1751_v57 }
 0x185   : > { %2133 = vrsqrt.f32 %v3576_v11  ;;  %v3629_v25 = vpop.eup %2125  ;;  %v1788_v49 = vadd.f32 %v2124_v62, %v1787_v63  ;;  %v1267_v53 = vsel %vm1266_vm6, %v3538_v58, %v1265_v60  ;;  %v1519_v13 = vadd.f32 %v1425_v31, %v1137_v4 }
 0x186   : > { %v1164_v15 = vand.u32 2147483648, %v3259_v51  ;;  %v2128_v37 = vpop.eup %2127  ;;  %v3635_v0 = vmul.f32 1.442695, %v1598_v50  ;;  %v1141_v20 = vsel %vm1140_vm10, %v3243_v38, %v1139_v41  ;;  %vm1168_vm14 = vcmp.eq.f32.partialorder %v3274_v34, inf  ;;  %v1455_v4 = vpop.permute.xlu1 %1454 }
 0x187   : > { %2135 = vrsqrt.f32 %v3580_v46  ;;  %v3642_v18 = vmul.f32 -20.0, %v1537_v5  ;;  %v1144_v30 = vsel %vm1142_vm11, %v1143_v36, %v1141_v20  ;;  %v1583_v56 = vmul.f32 -20.0, %v1519_v13 }
 0x188   : > { %v3647_v22 = vadd.f32 %v3446_v8, %v1788_v49  ;;  %v2130_v52 = vpop.eup %2129  ;;  %v3651_v1 = vsel %vm1268_vm7, %v1269_v24, %v1267_v53  ;;  %v1520_v35 = vadd.f32 %v1425_v31, %v1144_v30  ;;  %v1160_v28 = vmul.f32 %v2128_v37, %v3259_v51 }
 0x189   : > { %vm1170_vm15 = vcmp.eq.f32.partialorder %v3274_v34, 0.0  ;;  %v1689_v21 = vmul.f32 1.442695, %v1583_v56  ;;  %v1167_v54 = vmul.f32 %v2130_v52, %v3274_v34  ;;  %v1171_v38 = vand.u32 2147483648, %v3274_v34 }
 0x18a   : > { %2137 = vrsqrt.f32 %v3584_v17  ;;  %v1584_v8 = vmul.f32 -20.0, %v1520_v35  ;;  %v1162_v58 = vsel %vm1161_vm12, %v3259_v51, %v1160_v28  ;;  %vm1189_vm0 = vcmp.eq.f32.partialorder %v3571_v6, inf }
 0x18b   : > { %v2132_v61 = vpop.eup %2131  ;;  %v1192_v29 = vand.u32 2147483648, %v3571_v6  ;;  %2139 = vpow2.f32 %v1689_v21  ;;  %v1165_v39 = vsel %vm1163_vm13, %v1164_v15, %v1162_v58  ;;  %v1169_v33 = vsel %vm1168_vm14, %v3274_v34, %v1167_v54 }
 0x18c   : > { %v1188_v7 = vmul.f32 %v2132_v61, %v3571_v6  ;;  %v1691_v24 = vmul.f32 1.442695, %v1584_v8  ;;  %v1172_v3 = vsel %vm1170_vm15, %v1171_v38, %v1169_v33  ;;  %v1523_v23 = vadd.f32 %v1435_v43, %v1165_v39 }
 0x18d   : > { %2141 = vrsqrt.f32 %v3375_v9  ;;  %v1524_v26 = vadd.f32 %v1435_v43, %v1172_v3  ;;  %vm1191_vm1 = vcmp.eq.f32.partialorder %v3571_v6, 0.0  ;;  %vm1196_vm2 = vcmp.eq.f32.partialorder %v3576_v11, inf }
 0x18e   : > { %v1190_v31 = vsel %vm1189_vm0, %v3571_v6, %v1188_v7  ;;  %2143 = vpow2.f32 %v1691_v24  ;;  %v1587_v12 = vmul.f32 -20.0, %v1523_v23  ;;  %vm1198_vm3 = vcmp.eq.f32.partialorder %v3576_v11, 0.0 }
 0x18f   : > { %v2134_v51 = vpop.eup %2133  ;;  %v1193_v60 = vsel %vm1191_vm1, %v1192_v29, %v1190_v31  ;;  %v1588_v34 = vmul.f32 -20.0, %v1524_v26  ;;  %2145 = vrsqrt.f32 %v3403_v59  ;;  %v1199_v10 = vand.u32 2147483648, %v3576_v11  ;;  %v1465_v29 = vpop.permute.xlu1 %1464 }
 0x190   : > { %v1195_v42 = vmul.f32 %v2134_v51, %v3576_v11  ;;  %v1527_v57 = vadd.f32 %v1445_v16, %v1193_v60  ;;  %v1697_v36 = vmul.f32 1.442695, %v1587_v12  ;;  %vm1217_vm4 = vcmp.eq.f32.partialorder %v3580_v46, inf }
 0x191   : > { %v2136_v50 = vpop.eup %2135  ;;  %vm1219_vm5 = vcmp.eq.f32.partialorder %v3580_v46, 0.0  ;;  %v1699_v6 = vmul.f32 1.442695, %v1588_v34  ;;  %v1220_v41 = vand.u32 2147483648, %v3580_v46  ;;  %vm1224_vm6 = vcmp.eq.f32.partialorder %v3584_v17, inf }
 0x192   : > { %v1197_v63 = vsel %vm1196_vm2, %v3576_v11, %v1195_v42  ;;  %v1591_v5 = vmul.f32 -20.0, %v1527_v57  ;;  %v1216_v14 = vmul.f32 %v2136_v50, %v3580_v46  ;;  %2147 = vpow2.f32 %v1697_v36 }
 0x193   : > { %v1200_v62 = vsel %vm1198_vm3, %v1199_v10, %v1197_v63  ;;  %2149 = vpow2.f32 %v1699_v6  ;;  %vm1226_vm7 = vcmp.eq.f32.partialorder %v3584_v17, 0.0  ;;  %v1227_v30 = vand.u32 2147483648, %v3584_v17 }
 0x194   : > { %v2138_v49 = vpop.eup %2137  ;;  %v1528_v53 = vadd.f32 %v1445_v16, %v1200_v62  ;;  %v1705_v13 = vmul.f32 1.442695, %v1591_v5  ;;  %v1218_v15 = vsel %vm1217_vm4, %v3580_v46, %v1216_v14  ;;  %2151 = vrsqrt.f32 %v3590_v45  ;;  %v1475_v5 = vpop.permute.xlu1 %1474 }
 0x195   : > { %v1221_v37 = vsel %vm1219_vm5, %v1220_v41, %v1218_v15  ;;  %v1223_v20 = vmul.f32 %v2138_v49, %v3584_v17  ;;  %v2140_v11 = vpop.eup %2139  ;;  %vm1245_vm8 = vcmp.eq.f32.partialorder %v3375_v9, inf  ;;  %vm1247_vm9 = vcmp.eq.f32.partialorder %v3375_v9, 0.0 }
 0x196   : > { %v1592_v43 = vmul.f32 -20.0, %v1528_v53  ;;  %2153 = vpow2.f32 %v1705_v13  ;;  %v1531_v56 = vadd.f32 %v1455_v4, %v1221_v37  ;;  %v1753_v35 = vadd.f32 %v2140_v11, %v3626_v2 }
 0x197   : > { %v2142_v52 = vpop.eup %2141  ;;  %v1225_v46 = vsel %vm1224_vm6, %v3584_v17, %v1223_v20  ;;  %v1248_v2 = vand.u32 2147483648, %v3375_v9  ;;  %vm1252_vm10 = vcmp.eq.f32.partialorder %v3403_v59, inf  ;;  %v1255_v16 = vand.u32 2147483648, %v3403_v59 }
 0x198   : > { %v1707_v28 = vmul.f32 1.442695, %v1592_v43  ;;  %v1228_v21 = vsel %vm1226_vm7, %v1227_v30, %v1225_v46  ;;  %v1595_v54 = vmul.f32 -20.0, %v1531_v56  ;;  %v1244_v38 = vmul.f32 %v2142_v52, %v3375_v9  ;;  %v2144_v61 = vpop.eup %2143 }
 0x199   : > { %v1754_v8 = vadd.f32 %v3463_v40, %v1753_v35  ;;  %v1532_v58 = vadd.f32 %v1455_v4, %v1228_v21  ;;  %v2146_v39 = vpop.eup %2145  ;;  %v1790_v17 = vadd.f32 %v2144_v61, %v3647_v22  ;;  %vm1254_vm11 = vcmp.eq.f32.partialorder %v3403_v59, 0.0 }
 0x19a   : > { %2155 = vpow2.f32 %v1707_v28  ;;  %v1713_v33 = vmul.f32 1.442695, %v1595_v54  ;;  %v1246_v7 = vsel %vm1245_vm8, %v3375_v9, %v1244_v38  ;;  %v1251_v40 = vmul.f32 %v2146_v39, %v3403_v59 }
 0x19b   : > { %v1596_v24 = vmul.f32 -20.0, %v1532_v58  ;;  %v1249_v3 = vsel %vm1247_vm9, %v1248_v2, %v1246_v7  ;;  %2157 = vrsqrt.f32 %v3595_v32  ;;  %v1791_v23 = vadd.f32 %v3476_v55, %v1790_v17 }
 0x19c   : > { %2159 = vpow2.f32 %v1713_v33  ;;  %v1535_v22 = vadd.f32 %v1465_v29, %v1249_v3  ;;  %v2148_v26 = vpop.eup %2147  ;;  %v1253_v51 = vsel %vm1252_vm10, %v3403_v59, %v1251_v40  ;;  %v1538_v42 = vadd.f32 %v3613_v19, %v3651_v1 }
 0x19d   : > { %2161 = vpow2.f32 %v3608_v44  ;;  %v1715_v31 = vmul.f32 1.442695, %v1596_v24  ;;  %v2150_v9 = vpop.eup %2149  ;;  %v1755_v12 = vadd.f32 %v2148_v26, %v1754_v8  ;;  %v1256_v60 = vsel %vm1254_vm11, %v1255_v16, %v1253_v51 }
 0x19e   : > { %2163 = vpow2.f32 %v3635_v0  ;;  %v1599_v55 = vmul.f32 -20.0, %v1535_v22  ;;  %v2152_v34 = vpop.eup %2151  ;;  %v1792_v57 = vadd.f32 %v2150_v9, %v1791_v23  ;;  %v1536_v44 = vadd.f32 %v1465_v29, %v1256_v60 }
 0x19f   : > { %2165 = vpow2.f32 %v1715_v31  ;;  %v1725_v36 = vmul.f32 1.442695, %v3642_v18  ;;  %v1756_v10 = vadd.f32 %v3513_v48, %v1755_v12  ;;  %v1272_v59 = vmul.f32 %v2152_v34, %v3590_v45 }
 0x1a0   : > { %v2154_v50 = vpop.eup %2153  ;;  %v1721_v6 = vmul.f32 1.442695, %v1599_v55  ;;  %v1793_v0 = vadd.f32 %v3525_v47, %v1792_v57  ;;  %v1600_v63 = vmul.f32 -20.0, %v1536_v44  ;;  %vm1273_vm12 = vcmp.eq.f32.partialorder %v3590_v45, inf }
 0x1a1   : > { %v1276_v14 = vand.u32 2147483648, %v3590_v45  ;;  %v1757_v19 = vadd.f32 %v2154_v50, %v1756_v10  ;;  %v1274_v1 = vsel %vm1273_vm12, %v3590_v45, %v1272_v59  ;;  %vm1275_vm13 = vcmp.eq.f32.partialorder %v3590_v45, 0.0 }
 0x1a2   : > { %2167 = vpow2.f32 %v1721_v6  ;;  %v1723_v18 = vmul.f32 1.442695, %v1600_v63  ;;  %v1602_v4 = vmul.f32 -20.0, %v1538_v42  ;;  %vm1280_vm14 = vcmp.eq.f32.partialorder %v3595_v32, inf  ;;  %v3822_v63 = vld [vmem:[#allocation2_spill] sm:$0xff] }
 0x1a3   : > { %v1277_v62 = vsel %vm1275_vm13, %v1276_v14, %v1274_v1  ;;  %v1758_v41 = vadd.f32 %v3553_v27, %v1757_v19  ;;  %v1283_v45 = vand.u32 2147483648, %v3595_v32  ;;  %vm1282_vm15 = vcmp.eq.f32.partialorder %v3595_v32, 0.0 }
 0x1a4   : > { %v2156_v48 = vpop.eup %2155  ;;  %v1539_v49 = vadd.f32 %v1475_v5, %v1277_v62  ;;  %2169 = vpow2.f32 %v1723_v18  ;;  %v1727_v56 = vmul.f32 1.442695, %v1602_v4  ;;  %v2193_v44 = vmov 1966171168  }
 0x1a5   : > { %v2158_v47 = vpop.eup %2157  ;;  %v1794_v53 = vadd.f32 %v2156_v48, %v1793_v0  ;;  %2171 = vpow2.f32 %v1725_v36  ;;  %v1817_v50 = vunpack.c.l.s4 %v2193_v44  ;;  %v3823_v18 = vlaneseq }
 0x1a6   : > { %v2160_v13 = vpop.eup %2159  ;;  %v1279_v15 = vmul.f32 %v2158_v47, %v3595_v32  ;;  %v1603_v37 = vmul.f32 -20.0, %v1539_v49 }
 0x1a7   : > { %v2162_v20 = vpop.eup %2161  ;;  %v1759_v11 = vadd.f32 %v2160_v13, %v1758_v41  ;;  %v1795_v43 = vadd.f32 %v3629_v25, %v1794_v53  ;;  %v1818_v10 = vunpack.c.0.s8 %v1817_v50  ;;  %vm1833_vm0 = vcmp.lt.s32.totalorder %v3823_v18, 256 }
 0x1a8   : > { %v2164_v30 = vpop.eup %2163  ;;  %v1281_v27 = vsel %vm1280_vm14, %v3595_v32, %v1279_v15  ;;  %v1729_v52 = vmul.f32 1.442695, %v1603_v37 }
 0x1a9   : > { %v2166_v35 = vpop.eup %2165  ;;  %v1760_v46 = vadd.f32 %v2162_v20, %v1759_v11  ;;  %v1284_v28 = vsel %vm1282_vm15, %v1283_v45, %v1281_v27 }
 0x1aa   : > { %v1796_v21 = vadd.f32 %v2166_v35, %v1795_v43  ;;  %v1540_v54 = vadd.f32 %v1475_v5, %v1284_v28  ;;  %2173 = vpow2.f32 %v1729_v52  ;;  %v1821_v5 = vsub.s32 %v1818_v10, %v3822_v63 }
 0x1ab   : > { %2175 = vpow2.f32 %v1727_v56 }
 0x1ac   : > { %v2168_v38 = vpop.eup %2167  ;;  %v1797_v25 = vadd.f32 %v2164_v30, %v1796_v21  ;;  %v1604_v61 = vmul.f32 -20.0, %v1540_v54 }
 0x1ad   : > { %v1761_v8 = vadd.f32 %v2168_v38, %v1760_v46 }
 0x1ae   : > { %v1731_v58 = vmul.f32 1.442695, %v1604_v61  ;;  %v2170_v29 = vpop.eup %2169 }
 0x1af   : > { %v2172_v2 = vpop.eup %2171  ;;  %v1798_v39 = vadd.f32 %v2170_v29, %v1797_v25 }
 0x1b0   : > { %2177 = vpow2.f32 %v1731_v58  ;;  %v1762_v17 = vadd.f32 %v2172_v2, %v1761_v8 }
 0x1b4   : > { %v2174_v33 = vpop.eup %2173 }
 0x1b5   : > { %v1763_v32 = vadd.f32 %v2174_v33, %v1762_v17  ;;  %v2176_v7 = vpop.eup %2175 }
 0x1b6   : > { %v1799_v3 = vadd.f32 %v2176_v7, %v1798_v39 }
 0x1b7   : > { %v1764_v24 = vrot.slane %v1763_v32, 4 }
 0x1b9   : > { %v1765_v40 = vadd.f32 %v1764_v24, %v1763_v32 }
 0x1ba   : > { %v2178_v23 = vpop.eup %2177 }
 0x1bb   : > { %v1766_v16 = vrot.slane %v1765_v40, 2  ;;  %v1800_v22 = vadd.f32 %v2178_v23, %v1799_v3 }
 0x1bd   : > { %v1767_v26 = vadd.f32 %v1766_v16, %v1765_v40  ;;  %v1801_v31 = vrot.slane %v1800_v22, 4 }
 0x1bf   : > { %v1768_v51 = vrot.slane %v1767_v26, 1  ;;  %v1802_v9 = vadd.f32 %v1801_v31, %v1800_v22 }
 0x1c1   : > { %v1769_v12 = vadd.f32 %v1768_v51, %v1767_v26  ;;  %v1803_v60 = vrot.slane %v1802_v9, 2 }
 0x1c3   : > { %v1804_v55 = vadd.f32 %v1803_v60, %v1802_v9  ;;  %2179 = vlog2.f32 %v1769_v12 }
 0x1c5   : > { %v1805_v34 = vrot.slane %v1804_v55, 1 }
 0x1c7   : > { %v1806_v42 = vadd.f32 %v1805_v34, %v1804_v55 }
 0x1c9   : > { %2181 = vlog2.f32 %v1806_v42 }
 0x1cd   : > { %v2180_v57 = vpop.eup %2179 }
 0x1ce   : > { %v1808_v36 = vmul.f32 0.6931472, %v2180_v57 }
 0x1d0   : > { %v1811_v0 = vmul.f32 -0.05, %v1808_v36 }
 0x1d3   : > { %v2182_v6 = vpop.eup %2181 }
 0x1d4   : > { %v1810_v59 = vmul.f32 0.6931472, %v2182_v6 }
 0x1d6   : > { %v1812_v14 = vmul.f32 -0.05, %v1810_v59 }
 0x1d8   : > { %v1815_v19 = vcombine.low %v1811_v0, %v1812_v14 }
 0x1da   : > { %v1822_v1 = vrot.slane %v1815_v19, %v1821_v5 }
 0x1dc   : > { %v1829_v62 = vrot.slane %v1822_v1, %v1821_v5 }
 0x1de   : > { %1835 = vst.msk [vmem:[%s170_s13] sm:$0x3] %vm1833_vm0, %v1829_v62 }
 0x1df PF: > { %s13_s12 = sadd.s32 1, %s2189_s12  }
 0x1e0   : > { %p10_p4 = scmp.ge.s32.totalorder %s13_s12, 4  }
 0x1e2   :  { %12 = sbr.rel (!%p10_p4) target bundleno = 1 (0x1), region = 63 }

</bundles_post_ra>
